<compile_context>
chip_gen: v5e
topology: v5e:2x2
jax: 0.10.0
libtpu: 0.0.40
codegen_flags: <defaults>
</compile_context>

<pallas_src>
import functools

import jax
import jax.numpy as jnp
from jax.experimental import pallas as pl
from jax.experimental.pallas import tpu as pltpu

_VMEM_LIMIT = 32 * 1024 * 1024


def _layer_norm(h, gamma, beta, eps=1e-5):
    mean = jnp.mean(h, axis=-1, keepdims=True)
    var = jnp.mean(jnp.square(h - mean), axis=-1, keepdims=True)
    return (h - mean) * jax.lax.rsqrt(var + eps) * gamma + beta


# ----------------------------------------------------------------------------
# Kernel 1: VariancePredictor (duration predictor), batch folded into MXU rows.
#   conv1d(k=3,pad=1) -> relu -> layernorm -> conv1d(k=3,pad=1) -> relu
#   -> layernorm -> linear(F,1)          (masked_fill done in the wrapper)
# ----------------------------------------------------------------------------
def _predictor_kernel(x_ref, w1_ref, b1_ref, g1_ref, be1_ref,
                      w2_ref, b2_ref, g2_ref, be2_ref,
                      wl_ref, bl_ref, out_ref, *, seq_len):
    x = x_ref[...]                                        # (TM, H) f32, TM=nb*T
    TM = x.shape[0]
    row = jax.lax.broadcasted_iota(jnp.int32, (TM, 1), 0)
    pos = row if TM == seq_len else row % seq_len         # position within seq
    is_first = pos == 0
    is_last = pos == seq_len - 1

    def conv3(h, w_ref, b_ref):
        # neighbours h[t-1], h[t+1] via XLU sublane rotation; sequence
        # boundaries (incl. batch boundaries inside the tile) zeroed by masks
        h_prev = jnp.where(is_first, 0.0, pltpu.roll(h, shift=1, axis=0))
        h_next = jnp.where(is_last, 0.0, pltpu.roll(h, shift=TM - 1, axis=0))
        acc = jnp.dot(h_prev.astype(jnp.bfloat16), w_ref[0],
                      preferred_element_type=jnp.float32)
        acc = acc + jnp.dot(h.astype(jnp.bfloat16), w_ref[1],
                            preferred_element_type=jnp.float32)
        acc = acc + jnp.dot(h_next.astype(jnp.bfloat16), w_ref[2],
                            preferred_element_type=jnp.float32)
        return acc + b_ref[...]

    h = _layer_norm(jnp.maximum(conv3(x, w1_ref, b1_ref), 0.0),
                    g1_ref[...], be1_ref[...])
    # dropout_1: identity (eval mode)
    h = _layer_norm(jnp.maximum(conv3(h, w2_ref, b2_ref), 0.0),
                    g2_ref[...], be2_ref[...])
    # dropout_2: identity (eval mode)

    # linear (F -> 1) as VPU multiply + XLU row-reduce -> lane-dense (1,1,TM)
    o = jnp.sum(h * wl_ref[...], axis=-1) + bl_ref[0, 0]  # (TM,)
    out_ref[...] = o[None, None, :]


def duration_predictor(x, src_mask, p):
    B, T, H = x.shape
    F_ = p['vp_w1'].shape[-1]
    N = B * T

    # number of sequences per row tile: tiles are whole multiples of T so the
    # conv boundary handling needs no halos; budget keeps VMEM modest.
    ROW_BUDGET = 512
    nb = 1
    for d in range(B, 0, -1):
        if B % d == 0 and d * T <= ROW_BUDGET:
            nb = d
            break
    TM = nb * T
    ngrid = B // nb

    x2 = x.reshape(N, H)
    w1 = p['vp_w1'].astype(jnp.bfloat16)
    w2 = p['vp_w2'].astype(jnp.bfloat16)
    wl = p['vp_wl'].reshape(1, F_)                # (1, F) f32 row (VPU operand)
    bl = p['vp_bl'].reshape(1, 1)                 # scalar -> SMEM

    def rep(a):                                   # weights: same block each step
        z = (0,) * a.ndim
        return pl.BlockSpec(a.shape, lambda i, _z=z: _z)

    out = pl.pallas_call(
        functools.partial(_predictor_kernel, seq_len=T),
        out_shape=jax.ShapeDtypeStruct((ngrid, 1, TM), jnp.float32),
        grid_spec=pltpu.PrefetchScalarGridSpec(
            num_scalar_prefetch=0,
            grid=(ngrid,),
            in_specs=[
                pl.BlockSpec((TM, H), lambda i: (i, 0)),
                rep(w1), rep(p['vp_b1']), rep(p['vp_g1']), rep(p['vp_be1']),
                rep(w2), rep(p['vp_b2']), rep(p['vp_g2']), rep(p['vp_be2']),
                rep(wl),
                pl.BlockSpec(memory_space=pltpu.MemorySpace.SMEM),
            ],
            out_specs=pl.BlockSpec((1, 1, TM), lambda i: (i, 0, 0)),
        ),
        compiler_params=pltpu.CompilerParams(
            dimension_semantics=("parallel",),
            vmem_limit_bytes=_VMEM_LIMIT),
    )(x2, w1, p['vp_b1'], p['vp_g1'], p['vp_be1'],
      w2, p['vp_b2'], p['vp_g2'], p['vp_be2'], wl, bl)

    out = out.reshape(B, T)                       # row tiles are contiguous
    return jnp.where(src_mask, 0.0, out)          # masked_fill in the wrapper


# ----------------------------------------------------------------------------
# Kernel 2: VAE forward — batch folded into MXU rows, projections packed,
#            (x + z) add fused in.
#   mstats = mel @ [wmu|wlv]            -> [mu | logvar]
#   tstats = x @ [wtm|wtl][1:] + d*row0 -> [text_mu | text_logvar]
#   xz     = x + reparameterize(...) @ wup
# ----------------------------------------------------------------------------
def _vae_kernel(mel_ref, x_ref, dur_ref, teps_ref,
                wm_ref, bm_ref, wtx_ref, wtd_ref, bt_ref, wup_ref, bup_ref,
                xz_ref, mstats_ref, tstats_ref):
    vd = wup_ref.shape[0]

    # torch.nan_to_num on mel_mean: NaN -> 0, +/-inf -> finite max/min
    mel = mel_ref[...]                                      # (TM, 80) f32
    mel = jnp.where(jnp.isnan(mel), 0.0, mel)
    fmax = jnp.finfo(jnp.float32).max
    mel = jnp.clip(mel, -fmax, fmax)

    x_bf = x_ref[...]                                       # (TM, H) bf16
    dur = dur_ref[...]                                      # (TM, 1) f32
    teps = teps_ref[...]                                    # (TM, VD) f32

    # [mu | logvar] in one MXU pass
    mstats = jnp.dot(mel.astype(jnp.bfloat16), wm_ref[...],
                     preferred_element_type=jnp.float32) + bm_ref[...]
    # [text_mu | text_logvar]: K=256 matmul + duration row handled on the VPU
    tstats = (jnp.dot(x_bf, wtx_ref[...], preferred_element_type=jnp.float32)
              + dur * wtd_ref[...] + bt_ref[...])

    mu, lv = mstats[:, :vd], mstats[:, vd:]
    tmu, tlv = tstats[:, :vd], tstats[:, vd:]

    std = jnp.exp(0.5 * lv)                                 # f32 EUP
    tstd = jnp.exp(0.5 * tlv)
    # reference reparameterize: (text_eps*text_std + text_mu)*std + mu
    # (the mel-posterior eps is sampled but unused in the PyTorch module)
    out = (teps * tstd + tmu) * std + mu

    z = jnp.dot(out.astype(jnp.bfloat16), wup_ref[...],
                preferred_element_type=jnp.float32) + bup_ref[...]
    xz_ref[...] = (x_bf.astype(jnp.float32) + z).astype(xz_ref.dtype)
    mstats_ref[...] = mstats
    tstats_ref[...] = tstats


def vae_forward(mean_mels, x, durations_f, teps, p):
    B, T, H = x.shape
    VD = p['vae_wmu'].shape[1]
    UP = p['vae_wup'].shape[1]
    NMEL = mean_mels.shape[-1]
    N = B * T
    assert UP == H, "up_dim must equal encoder_hidden (x + LR(z) add)"

    # fold batch into the MXU row dimension; x goes in as bf16 (largest stream)
    mel2 = mean_mels.reshape(N, NMEL)
    x2 = x.reshape(N, H).astype(jnp.bfloat16)
    dur2 = durations_f.reshape(N, 1)
    teps2 = teps.reshape(N, VD)

    # pack the four k=1 convolutions into two matmuls; the duration row of the
    # text weights is kept separate so K stays 256-aligned
    wm = jnp.concatenate([p['vae_wmu'], p['vae_wlv']], axis=1).astype(jnp.bfloat16)
    bm = jnp.concatenate([p['vae_bmu'], p['vae_blv']], axis=1)
    wtx = jnp.concatenate([p['vae_wtm'][1:], p['vae_wtl'][1:]], axis=1).astype(jnp.bfloat16)
    wtd = jnp.concatenate([p['vae_wtm'][:1], p['vae_wtl'][:1]], axis=1)   # f32
    bt = jnp.concatenate([p['vae_btm'], p['vae_btl']], axis=1)
    wup = p['vae_wup'].astype(jnp.bfloat16)
    bup = p['vae_bup']

    TM = 512 if N > 512 else N                   # bigger row tile: fewer steps
    grid = (pl.cdiv(N, TM),)

    def row(c):
        return pl.BlockSpec((TM, c), lambda i: (i, 0))

    def rep(a):
        z = (0,) * a.ndim
        return pl.BlockSpec(a.shape, lambda i, _z=z: _z)

    xz2, mstats, tstats = pl.pallas_call(
        _vae_kernel,
        out_shape=(jax.ShapeDtypeStruct((N, H), jnp.bfloat16),       # x + z
                   jax.ShapeDtypeStruct((N, 2 * VD), jnp.float32),   # [mu|lv]
                   jax.ShapeDtypeStruct((N, 2 * VD), jnp.float32)),  # [tmu|tlv]
        grid_spec=pltpu.PrefetchScalarGridSpec(
            num_scalar_prefetch=0,
            grid=grid,
            in_specs=[row(NMEL), row(H), row(1), row(VD),
                      rep(wm), rep(bm), rep(wtx), rep(wtd), rep(bt),
                      rep(wup), rep(bup)],
            out_specs=[row(H), row(2 * VD), row(2 * VD)],
        ),
        compiler_params=pltpu.CompilerParams(
            dimension_semantics=("parallel",),
            vmem_limit_bytes=_VMEM_LIMIT),
    )(mel2, x2, dur2, teps2, wm, bm, wtx, wtd, bt, wup, bup)

    xz = xz2.reshape(B, T, H)
    mu = mstats[:, :VD].reshape(B, T, VD)
    lv = mstats[:, VD:].reshape(B, T, VD)
    tmu = tstats[:, :VD].reshape(B, T, VD)
    tlv = tstats[:, VD:].reshape(B, T, VD)
    return xz, mu, lv, tmu, tlv


# ----------------------------------------------------------------------------
# Kernel 3: LengthRegulator applied to the fused xz = (x + z) tensor.
#   frame->token one-hot built in-kernel (bf16) from cumulative durations;
#   gather is one MXU matmul; tiled over (batch, max_len); bf16 output.
# ----------------------------------------------------------------------------
def _lr_kernel(cum_ref, dur_ref, xz_ref, out_ref):
    TL = out_ref.shape[1]
    T = xz_ref.shape[1]
    frame0 = pl.program_id(1) * TL
    frames = frame0 + jax.lax.broadcasted_iota(jnp.int32, (TL, T), 0)
    cum = cum_ref[0]                              # (1, T) cumulative durations
    start = cum - dur_ref[0]                      # (1, T) segment start frame
    # zero rows for padding frames, zero cols for zero-duration tokens
    onehot = jnp.logical_and(frames >= start, frames < cum).astype(jnp.bfloat16)
    acc = jnp.dot(onehot, xz_ref[0], preferred_element_type=jnp.float32)
    out_ref[0] = acc.astype(out_ref.dtype)


def length_regulate(xz, durations, max_len):
    B, T, H = xz.shape
    d32 = durations.astype(jnp.int32)
    cum = jnp.cumsum(d32, axis=1).reshape(B, 1, T)
    dur = d32.reshape(B, 1, T)

    TL = max_len if max_len <= 256 else 256
    nl = pl.cdiv(max_len, TL)

    out = pl.pallas_call(
        _lr_kernel,
        out_shape=jax.ShapeDtypeStruct((B, max_len, H), jnp.bfloat16),
        grid_spec=pltpu.PrefetchScalarGridSpec(
            num_scalar_prefetch=0,
            grid=(B, nl),
            in_specs=[
                pl.BlockSpec((1, 1, T), lambda b, l: (b, 0, 0)),
                pl.BlockSpec((1, 1, T), lambda b, l: (b, 0, 0)),
                # block index constant across l -> Pallas skips re-fetching xz
                pl.BlockSpec((1, T, H), lambda b, l: (b, 0, 0)),
            ],
            out_specs=pl.BlockSpec((1, TL, H), lambda b, l: (b, l, 0)),
        ),
        compiler_params=pltpu.CompilerParams(
            dimension_semantics=("parallel", "arbitrary"),
            vmem_limit_bytes=_VMEM_LIMIT),
    )(cum, dur, xz)
    return out


# ----------------------------------------------------------------------------
# VarianceAdaptor forward (training branch)
# ----------------------------------------------------------------------------
def variance_adaptor_forward(params, x, src_mask, duration_target, max_len,
                             mean_mels, teps, mel_mask=None):
    log_duration_prediction = duration_predictor(x, src_mask, params)   # (B, T)
    duration_rounded = duration_target

    dur_f = duration_target.astype(jnp.float32)
    xz, mu, logvar, text_mu, text_logvar = vae_forward(
        mean_mels, x, dur_f, teps, params)

    # LR(x) + LR(z) == LR(x + z): gather is linear, pads are zero; the add is
    # fused into the VAE kernel (xz).
    out = length_regulate(xz, duration_target, max_len)
    mel_len = jnp.sum(duration_target, axis=-1).astype(jnp.int32)

    return (out, mu, logvar, text_mu, text_logvar,
            log_duration_prediction, duration_rounded, mel_len, mel_mask)


# ----------------------------------------------------------------------------
# deterministic parameter init (shapes follow the PyTorch module)
# ----------------------------------------------------------------------------
def init_params(key, H, FILT, K, VAE_DIM, UP_DIM, N_MEL):
    ks = jax.random.split(key, 16)

    def w(k, shape, fan_in):
        return jax.random.normal(k, shape, jnp.float32) / jnp.sqrt(float(fan_in))

    p = {
        # VariancePredictor — conv weights stored as (K, Cin, Cout)
        'vp_w1': w(ks[0], (K, H, FILT), H * K),
        'vp_b1': w(ks[1], (1, FILT), FILT),
        'vp_g1': jnp.ones((1, FILT), jnp.float32),
        'vp_be1': jnp.zeros((1, FILT), jnp.float32),
        'vp_w2': w(ks[2], (K, FILT, FILT), FILT * K),
        'vp_b2': w(ks[3], (1, FILT), FILT),
        'vp_g2': jnp.ones((1, FILT), jnp.float32),
        'vp_be2': jnp.zeros((1, FILT), jnp.float32),
        'vp_wl': w(ks[4], (FILT, 1), FILT),
        'vp_bl': jnp.zeros((1, 1), jnp.float32),
        # VAE — k=1 conv weights stored as (Cin, Cout)
        'vae_wmu': w(ks[5], (N_MEL, VAE_DIM), N_MEL),
        'vae_bmu': w(ks[6], (1, VAE_DIM), VAE_DIM),
        'vae_wlv': w(ks[7], (N_MEL, VAE_DIM), N_MEL),
        'vae_blv': w(ks[8], (1, VAE_DIM), VAE_DIM),
        'vae_wup': w(ks[9], (VAE_DIM, UP_DIM), VAE_DIM),
        'vae_bup': w(ks[10], (1, UP_DIM), UP_DIM),
        'vae_wtm': w(ks[11], (H + 1, VAE_DIM), H + 1),
        'vae_btm': w(ks[12], (1, VAE_DIM), VAE_DIM),
        'vae_wtl': w(ks[13], (H + 1, VAE_DIM), H + 1),
        'vae_btl': w(ks[14], (1, VAE_DIM), VAE_DIM),
    }
    return p


if __name__ == "__main__":
    B, T, H = 2, 8, 256          # encoder_hidden must be 256 (VAE hardcodes 256+1)
    FILT, KSZ = 256, 3
    VAE_DIM, UP_DIM, N_MEL = 8, 256, 80
    MAX_LEN = 16

    params = init_params(jax.random.PRNGKey(42), H, FILT, KSZ, VAE_DIM, UP_DIM, N_MEL)

    key = jax.random.PRNGKey(0)
    kx, km, ke = jax.random.split(key, 3)
    x = jax.random.normal(kx, (B, T, H), jnp.float32)
    src_len = jnp.array([8, 6], jnp.int32)
    src_mask = jnp.arange(T)[None, :] >= src_len[:, None]             # (B, T) bool
    duration_target = jnp.array([[2, 1, 0, 3, 1, 2, 1, 2],
                                 [1, 2, 1, 1, 1, 1, 0, 0]], jnp.int32)
    mean_mels = jax.random.normal(km, (B, T, N_MEL), jnp.float32)
    mean_mels = mean_mels.at[0, 0, 0].set(jnp.nan)                    # exercise nan_to_num
    # text-prior reparameterization noise (std-normal), sampled in glue code;
    # the mel-posterior eps is unused in the reference module and is dropped.
    teps = jax.random.normal(ke, (B, T, VAE_DIM), jnp.float32)

    outs = variance_adaptor_forward(params, x, src_mask, duration_target,
                                    MAX_LEN, mean_mels, teps, mel_mask=None)
    jax.block_until_ready([o for o in outs if o is not None])
    print("KERNEL_OK")
</pallas_src>

<mosaic_0001>
module attributes {stable_mosaic.version = 11 : i64} {
  func.func @_predictor_kernel(%arg0: i32, %arg1: memref<16x256xf32, #tpu.memory_space<vmem>>, %arg2: memref<3x256x256xbf16, #tpu.memory_space<vmem>>, %arg3: memref<1x256xf32, #tpu.memory_space<vmem>>, %arg4: memref<1x256xf32, #tpu.memory_space<vmem>>, %arg5: memref<1x256xf32, #tpu.memory_space<vmem>>, %arg6: memref<3x256x256xbf16, #tpu.memory_space<vmem>>, %arg7: memref<1x256xf32, #tpu.memory_space<vmem>>, %arg8: memref<1x256xf32, #tpu.memory_space<vmem>>, %arg9: memref<1x256xf32, #tpu.memory_space<vmem>>, %arg10: memref<1x256xf32, #tpu.memory_space<vmem>>, %arg11: memref<1x1xf32, #tpu.memory_space<smem>>, %arg12: memref<1x1x16xf32, #tpu.memory_space<vmem>>) attributes {dimension_semantics = [#tpu.dimension_semantics<parallel>], iteration_bounds = array<i64: 1>, scalar_prefetch = 0 : i64, scratch_operands = 0 : i64, tpu.core_type = #tpu.core_type<tc>, window_params = [{transform_indices = @transform_0, window_bounds = array<i64: 16, 256>}, {pipeline_mode = #tpu.pipeline_mode<synchronous>, transform_indices = @transform_1, window_bounds = array<i64: 3, 256, 256>}, {pipeline_mode = #tpu.pipeline_mode<synchronous>, transform_indices = @transform_2, window_bounds = array<i64: 1, 256>}, {pipeline_mode = #tpu.pipeline_mode<synchronous>, transform_indices = @transform_3, window_bounds = array<i64: 1, 256>}, {pipeline_mode = #tpu.pipeline_mode<synchronous>, transform_indices = @transform_4, window_bounds = array<i64: 1, 256>}, {pipeline_mode = #tpu.pipeline_mode<synchronous>, transform_indices = @transform_5, window_bounds = array<i64: 3, 256, 256>}, {pipeline_mode = #tpu.pipeline_mode<synchronous>, transform_indices = @transform_6, window_bounds = array<i64: 1, 256>}, {pipeline_mode = #tpu.pipeline_mode<synchronous>, transform_indices = @transform_7, window_bounds = array<i64: 1, 256>}, {pipeline_mode = #tpu.pipeline_mode<synchronous>, transform_indices = @transform_8, window_bounds = array<i64: 1, 256>}, {pipeline_mode = #tpu.pipeline_mode<synchronous>, transform_indices = @transform_9, window_bounds = array<i64: 1, 256>}, {transform_indices = @transform_10, window_bounds = array<i64: 1, 1>}, {transform_indices = @transform_11, window_bounds = array<i64: 1, 1, 16>}]} {
    %c0 = arith.constant 0 : index
    %c0_0 = arith.constant 0 : index
    %0 = vector.load %arg1[%c0, %c0_0] : memref<16x256xf32, #tpu.memory_space<vmem>>, vector<16x256xf32>
    %1 = tpu.iota {dimensions = array<i32: 0>} : vector<16x1xi32>
    %c8_i32 = arith.constant 8 : i32
    %c0_i32 = arith.constant 0 : i32
    %2 = arith.cmpi eq, %c8_i32, %c0_i32 : i32
    %c1_i32 = arith.constant 1 : i32
    %3 = arith.select %2, %c1_i32, %c8_i32 : i32
    %4 = vector.broadcast %3 : i32 to vector<16x1xi32>
    %5 = arith.remsi %1, %4 : vector<16x1xi32>
    %c0_i32_1 = arith.constant 0 : i32
    %6 = vector.broadcast %c0_i32_1 : i32 to vector<16x1xi32>
    %7 = arith.cmpi ne, %5, %6 : vector<16x1xi32>
    %c0_i32_2 = arith.constant 0 : i32
    %8 = vector.broadcast %c0_i32_2 : i32 to vector<16x1xi32>
    %9 = arith.cmpi slt, %5, %8 : vector<16x1xi32>
    %c0_i32_3 = arith.constant 0 : i32
    %10 = arith.cmpi slt, %3, %c0_i32_3 : i32
    %11 = vector.broadcast %10 : i1 to vector<16x1xi1>
    %12 = vector.broadcast %11 : vector<16x1xi1> to vector<16x1xi1>
    %13 = arith.xori %9, %12 : vector<16x1xi1>
    %14 = arith.andi %13, %7 : vector<16x1xi1>
    %15 = vector.broadcast %3 : i32 to vector<16x1xi32>
    %16 = arith.addi %5, %15 : vector<16x1xi32>
    %17 = arith.select %14, %16, %5 : vector<16x1xi1>, vector<16x1xi32>
    %c0_i32_4 = arith.constant 0 : i32
    %18 = vector.broadcast %c0_i32_4 : i32 to vector<16x1xi32>
    %19 = arith.cmpi eq, %17, %18 : vector<16x1xi32>
    %c7_i32 = arith.constant 7 : i32
    %20 = vector.broadcast %c7_i32 : i32 to vector<16x1xi32>
    %21 = arith.cmpi eq, %17, %20 : vector<16x1xi32>
    %c1_i32_5 = arith.constant 1 : i32
    %22 = tpu.dynamic_rotate %0 by %c1_i32_5 dim 0 : vector<16x256xf32>, i32 -> vector<16x256xf32>
    %cst = arith.constant 0.000000e+00 : f32
    %23 = vector.shape_cast %19 : vector<16x1xi1> to vector<16x1xi1>
    %24 = vector.broadcast %23 : vector<16x1xi1> to vector<16x256xi1>
    %25 = vector.broadcast %cst : f32 to vector<16x256xf32>
    %26 = arith.select %24, %25, %22 : vector<16x256xi1>, vector<16x256xf32>
    %c15_i32 = arith.constant 15 : i32
    %27 = tpu.dynamic_rotate %0 by %c15_i32 dim 0 : vector<16x256xf32>, i32 -> vector<16x256xf32>
    %cst_6 = arith.constant 0.000000e+00 : f32
    %28 = vector.shape_cast %21 : vector<16x1xi1> to vector<16x1xi1>
    %29 = vector.broadcast %28 : vector<16x1xi1> to vector<16x256xi1>
    %30 = vector.broadcast %cst_6 : f32 to vector<16x256xf32>
    %31 = arith.select %29, %30, %27 : vector<16x256xi1>, vector<16x256xf32>
    %32 = arith.truncf %26 : vector<16x256xf32> to vector<16x256xbf16>
    %c0_7 = arith.constant 0 : index
    %c0_8 = arith.constant 0 : index
    %c0_9 = arith.constant 0 : index
    %33 = vector.load %arg2[%c0_7, %c0_8, %c0_9] : memref<3x256x256xbf16, #tpu.memory_space<vmem>>, vector<1x256x256xbf16>
    %34 = vector.shape_cast %33 : vector<1x256x256xbf16> to vector<256x256xbf16>
    %cst_10 = arith.constant dense<0.000000e+00> : vector<16x256xf32>
    %35 = tpu.matmul %32, %34, %cst_10 {dimension_numbers = #tpu.dot_dimension_numbers<[1], [0], [0], [1], [0, 0, 1, 1], [], []>} : vector<16x256xbf16>, vector<256x256xbf16>, vector<16x256xf32> -> vector<16x256xf32>
    %36 = arith.truncf %0 : vector<16x256xf32> to vector<16x256xbf16>
    %c1 = arith.constant 1 : index
    %c0_11 = arith.constant 0 : index
    %c0_12 = arith.constant 0 : index
    %37 = vector.load %arg2[%c1, %c0_11, %c0_12] : memref<3x256x256xbf16, #tpu.memory_space<vmem>>, vector<1x256x256xbf16>
    %38 = vector.shape_cast %37 : vector<1x256x256xbf16> to vector<256x256xbf16>
    %cst_13 = arith.constant dense<0.000000e+00> : vector<16x256xf32>
    %39 = tpu.matmul %36, %38, %cst_13 {dimension_numbers = #tpu.dot_dimension_numbers<[1], [0], [0], [1], [0, 0, 1, 1], [], []>} : vector<16x256xbf16>, vector<256x256xbf16>, vector<16x256xf32> -> vector<16x256xf32>
    %40 = arith.addf %35, %39 : vector<16x256xf32>
    %41 = arith.truncf %31 : vector<16x256xf32> to vector<16x256xbf16>
    %c2 = arith.constant 2 : index
    %c0_14 = arith.constant 0 : index
    %c0_15 = arith.constant 0 : index
    %42 = vector.load %arg2[%c2, %c0_14, %c0_15] : memref<3x256x256xbf16, #tpu.memory_space<vmem>>, vector<1x256x256xbf16>
    %43 = vector.shape_cast %42 : vector<1x256x256xbf16> to vector<256x256xbf16>
    %cst_16 = arith.constant dense<0.000000e+00> : vector<16x256xf32>
    %44 = tpu.matmul %41, %43, %cst_16 {dimension_numbers = #tpu.dot_dimension_numbers<[1], [0], [0], [1], [0, 0, 1, 1], [], []>} : vector<16x256xbf16>, vector<256x256xbf16>, vector<16x256xf32> -> vector<16x256xf32>
    %45 = arith.addf %40, %44 : vector<16x256xf32>
    %c0_17 = arith.constant 0 : index
    %c0_18 = arith.constant 0 : index
    %46 = vector.load %arg3[%c0_17, %c0_18] : memref<1x256xf32, #tpu.memory_space<vmem>>, vector<1x256xf32>
    %47 = vector.broadcast %46 : vector<1x256xf32> to vector<16x256xf32>
    %48 = arith.addf %45, %47 : vector<16x256xf32>
    %cst_19 = arith.constant 0.000000e+00 : f32
    %49 = vector.broadcast %cst_19 : f32 to vector<16x256xf32>
    %50 = arith.maximumf %48, %49 : vector<16x256xf32>
    %c0_20 = arith.constant 0 : index
    %c0_21 = arith.constant 0 : index
    %51 = vector.load %arg4[%c0_20, %c0_21] : memref<1x256xf32, #tpu.memory_space<vmem>>, vector<1x256xf32>
    %c0_22 = arith.constant 0 : index
    %c0_23 = arith.constant 0 : index
    %52 = vector.load %arg5[%c0_22, %c0_23] : memref<1x256xf32, #tpu.memory_space<vmem>>, vector<1x256xf32>
    %cst_24 = arith.constant dense<0.000000e+00> : vector<16xf32>
    %53 = vector.multi_reduction <add>, %50, %cst_24 [1] : vector<16x256xf32> to vector<16xf32>
    %54 = vector.shape_cast %53 : vector<16xf32> to vector<16x1xf32>
    %cst_25 = arith.constant 2.560000e+02 : f32
    %55 = vector.broadcast %cst_25 : f32 to vector<16x1xf32>
    %56 = arith.divf %54, %55 : vector<16x1xf32>
    %57 = vector.broadcast %56 : vector<16x1xf32> to vector<16x256xf32>
    %58 = arith.subf %50, %57 : vector<16x256xf32>
    %59 = arith.mulf %58, %58 : vector<16x256xf32>
    %cst_26 = arith.constant dense<0.000000e+00> : vector<16xf32>
    %60 = vector.multi_reduction <add>, %59, %cst_26 [1] : vector<16x256xf32> to vector<16xf32>
    %61 = vector.shape_cast %60 : vector<16xf32> to vector<16x1xf32>
    %cst_27 = arith.constant 2.560000e+02 : f32
    %62 = vector.broadcast %cst_27 : f32 to vector<16x1xf32>
    %63 = arith.divf %61, %62 : vector<16x1xf32>
    %64 = vector.broadcast %56 : vector<16x1xf32> to vector<16x256xf32>
    %65 = arith.subf %50, %64 : vector<16x256xf32>
    %cst_28 = arith.constant 9.99999974E-6 : f32
    %66 = vector.broadcast %cst_28 : f32 to vector<16x1xf32>
    %67 = arith.addf %63, %66 : vector<16x1xf32>
    %68 = math.rsqrt %67 : vector<16x1xf32>
    %69 = vector.broadcast %68 : vector<16x1xf32> to vector<16x256xf32>
    %70 = arith.mulf %65, %69 : vector<16x256xf32>
    %71 = vector.broadcast %51 : vector<1x256xf32> to vector<16x256xf32>
    %72 = arith.mulf %70, %71 : vector<16x256xf32>
    %73 = vector.broadcast %52 : vector<1x256xf32> to vector<16x256xf32>
    %74 = arith.addf %72, %73 : vector<16x256xf32>
    %c1_i32_29 = arith.constant 1 : i32
    %75 = tpu.dynamic_rotate %74 by %c1_i32_29 dim 0 : vector<16x256xf32>, i32 -> vector<16x256xf32>
    %cst_30 = arith.constant 0.000000e+00 : f32
    %76 = vector.shape_cast %19 : vector<16x1xi1> to vector<16x1xi1>
    %77 = vector.broadcast %76 : vector<16x1xi1> to vector<16x256xi1>
    %78 = vector.broadcast %cst_30 : f32 to vector<16x256xf32>
    %79 = arith.select %77, %78, %75 : vector<16x256xi1>, vector<16x256xf32>
    %c15_i32_31 = arith.constant 15 : i32
    %80 = tpu.dynamic_rotate %74 by %c15_i32_31 dim 0 : vector<16x256xf32>, i32 -> vector<16x256xf32>
    %cst_32 = arith.constant 0.000000e+00 : f32
    %81 = vector.shape_cast %21 : vector<16x1xi1> to vector<16x1xi1>
    %82 = vector.broadcast %81 : vector<16x1xi1> to vector<16x256xi1>
    %83 = vector.broadcast %cst_32 : f32 to vector<16x256xf32>
    %84 = arith.select %82, %83, %80 : vector<16x256xi1>, vector<16x256xf32>
    %85 = arith.truncf %79 : vector<16x256xf32> to vector<16x256xbf16>
    %c0_33 = arith.constant 0 : index
    %c0_34 = arith.constant 0 : index
    %c0_35 = arith.constant 0 : index
    %86 = vector.load %arg6[%c0_33, %c0_34, %c0_35] : memref<3x256x256xbf16, #tpu.memory_space<vmem>>, vector<1x256x256xbf16>
    %87 = vector.shape_cast %86 : vector<1x256x256xbf16> to vector<256x256xbf16>
    %cst_36 = arith.constant dense<0.000000e+00> : vector<16x256xf32>
    %88 = tpu.matmul %85, %87, %cst_36 {dimension_numbers = #tpu.dot_dimension_numbers<[1], [0], [0], [1], [0, 0, 1, 1], [], []>} : vector<16x256xbf16>, vector<256x256xbf16>, vector<16x256xf32> -> vector<16x256xf32>
    %89 = arith.truncf %74 : vector<16x256xf32> to vector<16x256xbf16>
    %c1_37 = arith.constant 1 : index
    %c0_38 = arith.constant 0 : index
    %c0_39 = arith.constant 0 : index
    %90 = vector.load %arg6[%c1_37, %c0_38, %c0_39] : memref<3x256x256xbf16, #tpu.memory_space<vmem>>, vector<1x256x256xbf16>
    %91 = vector.shape_cast %90 : vector<1x256x256xbf16> to vector<256x256xbf16>
    %cst_40 = arith.constant dense<0.000000e+00> : vector<16x256xf32>
    %92 = tpu.matmul %89, %91, %cst_40 {dimension_numbers = #tpu.dot_dimension_numbers<[1], [0], [0], [1], [0, 0, 1, 1], [], []>} : vector<16x256xbf16>, vector<256x256xbf16>, vector<16x256xf32> -> vector<16x256xf32>
    %93 = arith.addf %88, %92 : vector<16x256xf32>
    %94 = arith.truncf %84 : vector<16x256xf32> to vector<16x256xbf16>
    %c2_41 = arith.constant 2 : index
    %c0_42 = arith.constant 0 : index
    %c0_43 = arith.constant 0 : index
    %95 = vector.load %arg6[%c2_41, %c0_42, %c0_43] : memref<3x256x256xbf16, #tpu.memory_space<vmem>>, vector<1x256x256xbf16>
    %96 = vector.shape_cast %95 : vector<1x256x256xbf16> to vector<256x256xbf16>
    %cst_44 = arith.constant dense<0.000000e+00> : vector<16x256xf32>
    %97 = tpu.matmul %94, %96, %cst_44 {dimension_numbers = #tpu.dot_dimension_numbers<[1], [0], [0], [1], [0, 0, 1, 1], [], []>} : vector<16x256xbf16>, vector<256x256xbf16>, vector<16x256xf32> -> vector<16x256xf32>
    %98 = arith.addf %93, %97 : vector<16x256xf32>
    %c0_45 = arith.constant 0 : index
    %c0_46 = arith.constant 0 : index
    %99 = vector.load %arg7[%c0_45, %c0_46] : memref<1x256xf32, #tpu.memory_space<vmem>>, vector<1x256xf32>
    %100 = vector.broadcast %99 : vector<1x256xf32> to vector<16x256xf32>
    %101 = arith.addf %98, %100 : vector<16x256xf32>
    %cst_47 = arith.constant 0.000000e+00 : f32
    %102 = vector.broadcast %cst_47 : f32 to vector<16x256xf32>
    %103 = arith.maximumf %101, %102 : vector<16x256xf32>
    %c0_48 = arith.constant 0 : index
    %c0_49 = arith.constant 0 : index
    %104 = vector.load %arg8[%c0_48, %c0_49] : memref<1x256xf32, #tpu.memory_space<vmem>>, vector<1x256xf32>
    %c0_50 = arith.constant 0 : index
    %c0_51 = arith.constant 0 : index
    %105 = vector.load %arg9[%c0_50, %c0_51] : memref<1x256xf32, #tpu.memory_space<vmem>>, vector<1x256xf32>
    %cst_52 = arith.constant dense<0.000000e+00> : vector<16xf32>
    %106 = vector.multi_reduction <add>, %103, %cst_52 [1] : vector<16x256xf32> to vector<16xf32>
    %107 = vector.shape_cast %106 : vector<16xf32> to vector<16x1xf32>
    %cst_53 = arith.constant 2.560000e+02 : f32
    %108 = vector.broadcast %cst_53 : f32 to vector<16x1xf32>
    %109 = arith.divf %107, %108 : vector<16x1xf32>
    %110 = vector.broadcast %109 : vector<16x1xf32> to vector<16x256xf32>
    %111 = arith.subf %103, %110 : vector<16x256xf32>
    %112 = arith.mulf %111, %111 : vector<16x256xf32>
    %cst_54 = arith.constant dense<0.000000e+00> : vector<16xf32>
    %113 = vector.multi_reduction <add>, %112, %cst_54 [1] : vector<16x256xf32> to vector<16xf32>
    %114 = vector.shape_cast %113 : vector<16xf32> to vector<16x1xf32>
    %cst_55 = arith.constant 2.560000e+02 : f32
    %115 = vector.broadcast %cst_55 : f32 to vector<16x1xf32>
    %116 = arith.divf %114, %115 : vector<16x1xf32>
    %117 = vector.broadcast %109 : vector<16x1xf32> to vector<16x256xf32>
    %118 = arith.subf %103, %117 : vector<16x256xf32>
    %cst_56 = arith.constant 9.99999974E-6 : f32
    %119 = vector.broadcast %cst_56 : f32 to vector<16x1xf32>
    %120 = arith.addf %116, %119 : vector<16x1xf32>
    %121 = math.rsqrt %120 : vector<16x1xf32>
    %122 = vector.broadcast %121 : vector<16x1xf32> to vector<16x256xf32>
    %123 = arith.mulf %118, %122 : vector<16x256xf32>
    %124 = vector.broadcast %104 : vector<1x256xf32> to vector<16x256xf32>
    %125 = arith.mulf %123, %124 : vector<16x256xf32>
    %126 = vector.broadcast %105 : vector<1x256xf32> to vector<16x256xf32>
    %127 = arith.addf %125, %126 : vector<16x256xf32>
    %c0_57 = arith.constant 0 : index
    %c0_58 = arith.constant 0 : index
    %128 = vector.load %arg10[%c0_57, %c0_58] : memref<1x256xf32, #tpu.memory_space<vmem>>, vector<1x256xf32>
    %129 = vector.broadcast %128 : vector<1x256xf32> to vector<16x256xf32>
    %130 = arith.mulf %127, %129 : vector<16x256xf32>
    %cst_59 = arith.constant dense<0.000000e+00> : vector<16xf32>
    %131 = vector.multi_reduction <add>, %130, %cst_59 [1] : vector<16x256xf32> to vector<16xf32>
    %c0_60 = arith.constant 0 : index
    %c0_61 = arith.constant 0 : index
    %132 = memref.load %arg11[%c0_60, %c0_61] : memref<1x1xf32, #tpu.memory_space<smem>>
    %133 = vector.broadcast %132 : f32 to vector<16xf32>
    %134 = arith.addf %131, %133 : vector<16xf32>
    %135 = vector.shape_cast %134 : vector<16xf32> to vector<1x1x16xf32>
    %c0_62 = arith.constant 0 : index
    %c0_63 = arith.constant 0 : index
    %c0_64 = arith.constant 0 : index
    %136 = vector.load %arg12[%c0_62, %c0_63, %c0_64] : memref<1x1x16xf32, #tpu.memory_space<vmem>>, vector<1x1x16xf32>
    tpu.vector_store %arg12[%c0_62, %c0_63, %c0_64], %135 {strides = array<i32>} : memref<1x1x16xf32, #tpu.memory_space<vmem>>, vector<1x1x16xf32>,
    return
  }
  func.func @transform_0(%arg0: i32) -> (i32, i32) {
    %c0_i32 = arith.constant 0 : i32
    %c0_i32_0 = arith.constant 0 : i32
    return %arg0, %c0_i32 : i32, i32
  }
  func.func @transform_1(%arg0: i32) -> (i32, i32, i32) {
    %c0_i32 = arith.constant 0 : i32
    %c0_i32_0 = arith.constant 0 : i32
    %c0_i32_1 = arith.constant 0 : i32
    %c0_i32_2 = arith.constant 0 : i32
    return %c0_i32, %c0_i32_0, %c0_i32_1 : i32, i32, i32
  }
  func.func @transform_2(%arg0: i32) -> (i32, i32) {
    %c0_i32 = arith.constant 0 : i32
    %c0_i32_0 = arith.constant 0 : i32
    %c0_i32_1 = arith.constant 0 : i32
    return %c0_i32, %c0_i32_0 : i32, i32
  }
  func.func @transform_3(%arg0: i32) -> (i32, i32) {
    %c0_i32 = arith.constant 0 : i32
    %c0_i32_0 = arith.constant 0 : i32
    %c0_i32_1 = arith.constant 0 : i32
    return %c0_i32, %c0_i32_0 : i32, i32
  }
  func.func @transform_4(%arg0: i32) -> (i32, i32) {
    %c0_i32 = arith.constant 0 : i32
    %c0_i32_0 = arith.constant 0 : i32
    %c0_i32_1 = arith.constant 0 : i32
    return %c0_i32, %c0_i32_0 : i32, i32
  }
  func.func @transform_5(%arg0: i32) -> (i32, i32, i32) {
    %c0_i32 = arith.constant 0 : i32
    %c0_i32_0 = arith.constant 0 : i32
    %c0_i32_1 = arith.constant 0 : i32
    %c0_i32_2 = arith.constant 0 : i32
    return %c0_i32, %c0_i32_0, %c0_i32_1 : i32, i32, i32
  }
  func.func @transform_6(%arg0: i32) -> (i32, i32) {
    %c0_i32 = arith.constant 0 : i32
    %c0_i32_0 = arith.constant 0 : i32
    %c0_i32_1 = arith.constant 0 : i32
    return %c0_i32, %c0_i32_0 : i32, i32
  }
  func.func @transform_7(%arg0: i32) -> (i32, i32) {
    %c0_i32 = arith.constant 0 : i32
    %c0_i32_0 = arith.constant 0 : i32
    %c0_i32_1 = arith.constant 0 : i32
    return %c0_i32, %c0_i32_0 : i32, i32
  }
  func.func @transform_8(%arg0: i32) -> (i32, i32) {
    %c0_i32 = arith.constant 0 : i32
    %c0_i32_0 = arith.constant 0 : i32
    %c0_i32_1 = arith.constant 0 : i32
    return %c0_i32, %c0_i32_0 : i32, i32
  }
  func.func @transform_9(%arg0: i32) -> (i32, i32) {
    %c0_i32 = arith.constant 0 : i32
    %c0_i32_0 = arith.constant 0 : i32
    %c0_i32_1 = arith.constant 0 : i32
    return %c0_i32, %c0_i32_0 : i32, i32
  }
  func.func @transform_10(%arg0: i32) -> (i32, i32) {
    %c0_i32 = arith.constant 0 : i32
    %c0_i32_0 = arith.constant 0 : i32
    %c0_i32_1 = arith.constant 0 : i32
    return %c0_i32, %c0_i32_0 : i32, i32
  }
  func.func @transform_11(%arg0: i32) -> (i32, i32, i32) {
    %c0_i32 = arith.constant 0 : i32
    %c0_i32_0 = arith.constant 0 : i32
    %c0_i32_1 = arith.constant 0 : i32
    return %arg0, %c0_i32, %c0_i32_0 : i32, i32, i32
  }
}

</mosaic_0001>

<bundles_post_ra>
// kernel: tpu_custom_call.1
= control target key start
LH: loop header
LB: loop body
LE: loop exit
PB: predicated region body
PF: predicated region fallthrough
CT: control target
= control target key end

     0   :  { %17 = vsyncpa [#allocation4], 0  ;;  %s3485_s0 = inlined_call_operand.hbm [shape: f32[16,256], index: 0, kind: input, shape index: {}]   ;;  %s3486_s1 = inlined_call_operand.hbm [shape: bf16[3,256,256], index: 1, kind: input, shape index: {}]   ;;  %s3487_s2 = inlined_call_operand.vmem [shape: f32[1,256], index: 2, kind: input, shape index: {}]   ;;  %s3488_s3 = inlined_call_operand.vmem [shape: f32[1,256], index: 3, kind: input, shape index: {}]   ;;  %s3489_s4 = inlined_call_operand.hbm [shape: f32[1,256], index: 4, kind: input, shape index: {}]   ;;  %s3490_s5 = inlined_call_operand.hbm [shape: bf16[3,256,256], index: 5, kind: input, shape index: {}]   ;;  %s3491_s6 = inlined_call_operand.vmem [shape: f32[1,256], index: 6, kind: input, shape index: {}]   ;;  %s3492_s7 = inlined_call_operand.vmem [shape: f32[1,256], index: 7, kind: input, shape index: {}]   ;;  %s3493_s8 = inlined_call_operand.hbm [shape: f32[1,256], index: 8, kind: input, shape index: {}]   ;;  %s3494_s9 = inlined_call_operand.vmem [shape: f32[1,256], index: 9, kind: input, shape index: {}]   ;;  %s3495_s10 = inlined_call_operand.<no memory space> [shape: f32[1,1], index: 10, kind: input, shape index: {}]   ;;  %s3496_s11 = inlined_call_operand.hbm [shape: f32[1,1,16], index: 11, kind: output, shape index: {}]  }
   0x1   :  { %18 = vsyncpa [#allocation7], 0 }
   0x2   :  { %19 = vsyncpa [#allocation10], 0  ;;  %s38_s19 = sshll.u32 %s3486_s1, 4  ;;  %s39_s19 = int_to_ptr.hbm [resolvable:$true] %s38_s19 }
   0x3   :  { %20 = vsyncpa [#allocation5], 0  ;;  %s3162_s20 = smov [#allocation6]   ;;  %s66_s24 = sshll.u32 %s3490_s5, 4  ;;  %s67_s24 = int_to_ptr.hbm [resolvable:$true] %s66_s24 }
   0x4   :  { %s40_s21 = sshll.u32 %s3162_s20, 4  ;;  %s3163_s25 = smov 128   ;;  %s41_s21 = int_to_ptr.vmem [resolvable:$true] %s40_s21 }
   0x5   :  { %s3164_s26 = smov 8   ;;  %s3165_s27 = smov [#allocation9]  }
   0x6   :  { %46 = dma.hbm_to_vmem [thread:$0]  %s39_s19, 12288, %s41_s21, [#allocation7], %s3163_s25, %s3163_s25, %s3164_s26  }
   0x7   :  { %s68_s28 = sshll.u32 %s3165_s27, 4  ;;  %s25_s12 = sshll.u32 %s3485_s0, 4  ;;  %s69_s28 = int_to_ptr.vmem [resolvable:$true] %s68_s28  ;;  %s26_s12 = int_to_ptr.hbm [resolvable:$true] %s25_s12 }
   0x8   :  { %74 = dma.hbm_to_vmem [thread:$0]  %s67_s24, 12288, %s69_s28, [#allocation10], %s3163_s25, %s3163_s25, %s3164_s26  }
   0x9   :  { %s3166_s1 = smov [#allocation3]   ;;  %s56_s5 = sshll.u32 %s3489_s4, 4  ;;  %s57_s5 = int_to_ptr.hbm [resolvable:$true] %s56_s5 }
   0xa   :  { %s27_s13 = sshll.u32 %s3166_s1, 4  ;;  %s3167_s16 = smov 256   ;;  %s28_s13 = int_to_ptr.vmem [resolvable:$true] %s27_s13 }
   0xb   :  { %s3168_s17 = smov 16   ;;  %s3169_s18 = smov [#allocation8]  }
   0xc   :  { %33 = dma.hbm_to_vmem [thread:$0]  %s26_s12, 512, %s28_s13, [#allocation4], %s3167_s16, %s3167_s16, %s3168_s17  }
   0xd   :  { %s58_s19 = sshll.u32 %s3169_s18, 4  ;;  %s84_s0 = sshll.u32 %s3493_s8, 4  ;;  %s59_s19 = int_to_ptr.vmem [resolvable:$true] %s58_s19  ;;  %s85_s0 = int_to_ptr.hbm [resolvable:$true] %s84_s0 }
   0xe   :  { %61 = dma.hbm_to_vmem [thread:$0]  %s57_s5, 32, %s59_s19, [#allocation7]  }
   0xf   :  { %s3170_s22 = smov [#allocation11]  }
  0x10   :  { %s86_s23 = sshll.u32 %s3170_s22, 4  ;;  %s87_s23 = int_to_ptr.vmem [resolvable:$true] %s86_s23 }
  0x11   :  { %89 = dma.hbm_to_vmem [thread:$0]  %s85_s0, 32, %s87_s23, [#allocation10]  }
  0x12   :  { %3154 = dma.done.wait [#allocation4], 512  }
  0x13   :  { %3155 = vsyncadd [#allocation4], 4294966784 }
  0x14   :  { %3156 = dma.done.wait [#allocation7], 12320  }
  0x15   :  { %3157 = vsyncadd [#allocation7], 4294954976 }
  0x16   :  { %3158 = dma.done.wait [#allocation10], 12320  }
  0x17   :  { %3159 = vsyncadd [#allocation10], 4294954976  ;;  %v2003_v0 = vld [vmem:[#allocation6 + $0x170] sm:$0xf]  ;;  %v2840_v1 = vld [vmem:[#allocation6 + $0x174] sm:$0xf0] }
  0x18   :  { %v2067_v2 = vld [vmem:[#allocation6 + $0x1f0] sm:$0xf]  ;;  %v2004_v3 = vor.u32 %v2840_v1, %v2003_v0  ;;  %v2856_v4 = vld [vmem:[#allocation6 + $0x1f4] sm:$0xf0]  ;;  %v2839_v5 = vld [vmem:[#allocation6 + $0x174] sm:$0xf] }
  0x19   :  { %v2005_v6 = vld [vmem:[#allocation6 + $0x178] sm:$0xf0]  ;;  %v2068_v7 = vor.u32 %v2856_v4, %v2067_v2  ;;  %v2855_v9 = vld [vmem:[#allocation6 + $0x1f4] sm:$0xf]  ;;  %v1995_v11 = vld [vmem:[#allocation6 + $0x160] sm:$0xf] }
  0x1a   :  { %v2008_v8 = vor.u32 %v2839_v5, %v2005_v6  ;;  %v2069_v10 = vld [vmem:[#allocation6 + $0x1f8] sm:$0xf0]  ;;  %412 = vmatpush.bf16.msra.mxu0 %v2004_v3  ;;  %v2838_v13 = vld [vmem:[#allocation6 + $0x164] sm:$0xf0]  ;;  %v2059_v14 = vld [vmem:[#allocation6 + $0x1e0] sm:$0xf] }
  0x1b   :  { %v2072_v12 = vor.u32 %v2855_v9, %v2069_v10  ;;  %v2854_v15 = vld [vmem:[#allocation6 + $0x1e4] sm:$0xf0]  ;;  %426 = vmatpush.bf16.msra.mxu1 %v2068_v7  ;;  %v1996_v16 = vor.u32 %v2838_v13, %v1995_v11  ;;  %v2837_v18 = vld [vmem:[#allocation6 + $0x164] sm:$0xf]  ;;  %v1997_v19 = vld [vmem:[#allocation6 + $0x168] sm:$0xf0] }
  0x1c   :  { %440 = vmatpush.bf16.msra.mxu2 %v2008_v8  ;;  %v2060_v17 = vor.u32 %v2854_v15, %v2059_v14  ;;  %v2853_v20 = vld [vmem:[#allocation6 + $0x1e4] sm:$0xf]  ;;  %v2000_v21 = vor.u32 %v2837_v18, %v1997_v19  ;;  %v2061_v22 = vld [vmem:[#allocation6 + $0x1e8] sm:$0xf0]  ;;  %v1987_v23 = vld [vmem:[#allocation6 + $0x150] sm:$0xf] }
  0x1d   :  { %454 = vmatpush.bf16.msra.mxu3 %v2072_v12  ;;  %v2836_v24 = vld [vmem:[#allocation6 + $0x154] sm:$0xf0]  ;;  %v2064_v25 = vor.u32 %v2853_v20, %v2061_v22  ;;  %v2051_v26 = vld [vmem:[#allocation6 + $0x1d0] sm:$0xf]  ;;  %v2835_v28 = vld [vmem:[#allocation6 + $0x154] sm:$0xf] }
  0x1e   :  { %v2852_v27 = vld [vmem:[#allocation6 + $0x1d4] sm:$0xf0]  ;;  %413 = vmatpush.bf16.msra.mxu0 %v1996_v16  ;;  %v1988_v29 = vor.u32 %v2836_v24, %v1987_v23  ;;  %v1989_v30 = vld [vmem:[#allocation6 + $0x158] sm:$0xf0]  ;;  %v2851_v31 = vld [vmem:[#allocation6 + $0x1d4] sm:$0xf] }
  0x1f   :  { %v2053_v32 = vld [vmem:[#allocation6 + $0x1d8] sm:$0xf0]  ;;  %427 = vmatpush.bf16.msra.mxu1 %v2060_v17  ;;  %v2052_v33 = vor.u32 %v2852_v27, %v2051_v26  ;;  %v1992_v34 = vor.u32 %v2835_v28, %v1989_v30  ;;  %v1979_v35 = vld [vmem:[#allocation6 + $0x140] sm:$0xf]  ;;  %v2834_v36 = vld [vmem:[#allocation6 + $0x144] sm:$0xf0] }
  0x20   :  { %441 = vmatpush.bf16.msra.mxu2 %v2000_v21  ;;  %v2043_v37 = vld [vmem:[#allocation6 + $0x1c0] sm:$0xf]  ;;  %v2056_v38 = vor.u32 %v2851_v31, %v2053_v32  ;;  %v2850_v39 = vld [vmem:[#allocation6 + $0x1c4] sm:$0xf0]  ;;  %v2833_v40 = vld [vmem:[#allocation6 + $0x144] sm:$0xf]  ;;  %v1980_v44 = vor.u32 %v2834_v36, %v1979_v35 }
  0x21   :  { %455 = vmatpush.bf16.msra.mxu3 %v2064_v25  ;;  %v1981_v41 = vld [vmem:[#allocation6 + $0x148] sm:$0xf0]  ;;  %v2849_v42 = vld [vmem:[#allocation6 + $0x1c4] sm:$0xf]  ;;  %v2044_v45 = vor.u32 %v2850_v39, %v2043_v37  ;;  %v1971_v47 = vld [vmem:[#allocation6 + $0x130] sm:$0xf] }
  0x22   :  { %v2045_v43 = vld [vmem:[#allocation6 + $0x1c8] sm:$0xf0]  ;;  %414 = vmatpush.bf16.msra.mxu0 %v1988_v29  ;;  %v1984_v46 = vor.u32 %v2833_v40, %v1981_v41  ;;  %v2832_v48 = vld [vmem:[#allocation6 + $0x134] sm:$0xf0]  ;;  %v2035_v49 = vld [vmem:[#allocation6 + $0x1b0] sm:$0xf] }
  0x23   :  { %428 = vmatpush.bf16.msra.mxu1 %v2052_v33  ;;  %v2048_v50 = vor.u32 %v2849_v42, %v2045_v43  ;;  %v2848_v51 = vld [vmem:[#allocation6 + $0x1b4] sm:$0xf0]  ;;  %v2831_v52 = vld [vmem:[#allocation6 + $0x134] sm:$0xf]  ;;  %v1973_v53 = vld [vmem:[#allocation6 + $0x138] sm:$0xf0]  ;;  %v1972_v56 = vor.u32 %v2832_v48, %v1971_v47 }
  0x24   :  { %442 = vmatpush.bf16.msra.mxu2 %v1992_v34  ;;  %v2847_v54 = vld [vmem:[#allocation6 + $0x1b4] sm:$0xf]  ;;  %v2037_v55 = vld [vmem:[#allocation6 + $0x1b8] sm:$0xf0]  ;;  %v2036_v57 = vor.u32 %v2848_v51, %v2035_v49  ;;  %v1976_v58 = vor.u32 %v2831_v52, %v1973_v53  ;;  %v1963_v59 = vld [vmem:[#allocation6 + $0x120] sm:$0xf] }
  0x25   :  { %456 = vmatpush.bf16.msra.mxu3 %v2056_v38  ;;  %v2830_v60 = vld [vmem:[#allocation6 + $0x124] sm:$0xf0]  ;;  %v2027_v61 = vld [vmem:[#allocation6 + $0x1a0] sm:$0xf]  ;;  %v2040_v62 = vor.u32 %v2847_v54, %v2037_v55  ;;  %v2829_v0 = vld [vmem:[#allocation6 + $0x124] sm:$0xf] }
  0x26   :  { %415 = vmatpush.bf16.msra.mxu0 %v1980_v44  ;;  %v2846_v63 = vld [vmem:[#allocation6 + $0x1a4] sm:$0xf0]  ;;  %v1965_v1 = vld [vmem:[#allocation6 + $0x128] sm:$0xf0]  ;;  %v2845_v2 = vld [vmem:[#allocation6 + $0x1a4] sm:$0xf]  ;;  %v1964_v4 = vor.u32 %v2830_v60, %v1963_v59 }
  0x27   :  { %429 = vmatpush.bf16.msra.mxu1 %v2044_v45  ;;  %v2029_v3 = vld [vmem:[#allocation6 + $0x1a8] sm:$0xf0]  ;;  %v2028_v5 = vor.u32 %v2846_v63, %v2027_v61  ;;  %v1968_v6 = vor.u32 %v2829_v0, %v1965_v1  ;;  %v1955_v7 = vld [vmem:[#allocation6 + $0x110] sm:$0xf]  ;;  %v2828_v8 = vld [vmem:[#allocation6 + $0x114] sm:$0xf0] }
  0x28   :  { %443 = vmatpush.bf16.msra.mxu2 %v1984_v46  ;;  %v2019_v9 = vld [vmem:[#allocation6 + $0x190] sm:$0xf]  ;;  %v2032_v10 = vor.u32 %v2845_v2, %v2029_v3  ;;  %v2844_v11 = vld [vmem:[#allocation6 + $0x194] sm:$0xf0]  ;;  %v2827_v12 = vld [vmem:[#allocation6 + $0x114] sm:$0xf]  ;;  %v1956_v16 = vor.u32 %v2828_v8, %v1955_v7 }
  0x29   :  { %457 = vmatpush.bf16.msra.mxu3 %v2048_v50  ;;  %v1957_v13 = vld [vmem:[#allocation6 + $0x118] sm:$0xf0]  ;;  %v2843_v14 = vld [vmem:[#allocation6 + $0x194] sm:$0xf]  ;;  %v1947_v17 = vld [vmem:[#allocation6 + $0x100] sm:$0xf]  ;;  %v2020_v19 = vor.u32 %v2844_v11, %v2019_v9 }
  0x2a   :  { %416 = vmatpush.bf16.msra.mxu0 %v1972_v56  ;;  %v2021_v15 = vld [vmem:[#allocation6 + $0x198] sm:$0xf0]  ;;  %v2826_v18 = vld [vmem:[#allocation6 + $0x104] sm:$0xf0]  ;;  %v1960_v20 = vor.u32 %v2827_v12, %v1957_v13  ;;  %v2011_v21 = vld [vmem:[#allocation6 + $0x180] sm:$0xf] }
  0x2b   :  { %430 = vmatpush.bf16.msra.mxu1 %v2036_v57  ;;  %v2842_v22 = vld [vmem:[#allocation6 + $0x184] sm:$0xf0]  ;;  %v2825_v23 = vld [vmem:[#allocation6 + $0x104] sm:$0xf]  ;;  %v2024_v24 = vor.u32 %v2843_v14, %v2021_v15  ;;  %v1949_v25 = vld [vmem:[#allocation6 + $0x108] sm:$0xf0]  ;;  %v1948_v31 = vor.u32 %v2826_v18, %v1947_v17 }
  0x2c   :  { %444 = vmatpush.bf16.msra.mxu2 %v1976_v58  ;;  %v2841_v26 = vld [vmem:[#allocation6 + $0x184] sm:$0xf]  ;;  %v2013_v27 = vld [vmem:[#allocation6 + $0x188] sm:$0xf0]  ;;  %v2131_v28 = vld [vmem:[#allocation6 + $0x70] sm:$0xf]  ;;  %v2012_v35 = vor.u32 %v2842_v22, %v2011_v21  ;;  %v1952_v36 = vor.u32 %v2825_v23, %v1949_v25 }
  0x2d   :  { %458 = vmatpush.bf16.msra.mxu3 %v2040_v62  ;;  %v2808_v29 = vld [vmem:[#allocation6 + $0x74] sm:$0xf0]  ;;  %v2195_v30 = vld [vmem:[#allocation6 + $0xf0] sm:$0xf]  ;;  %v2807_v33 = vld [vmem:[#allocation6 + $0x74] sm:$0xf]  ;;  %v2016_v39 = vor.u32 %v2841_v26, %v2013_v27 }
  0x2e   :  { %417 = vmatpush.bf16.msra.mxu0 %v1964_v4  ;;  %v2824_v32 = vld [vmem:[#allocation6 + $0xf4] sm:$0xf0]  ;;  %v2133_v34 = vld [vmem:[#allocation6 + $0x78] sm:$0xf0]  ;;  %v2823_v37 = vld [vmem:[#allocation6 + $0xf4] sm:$0xf]  ;;  %v2132_v40 = vor.u32 %v2808_v29, %v2131_v28 }
  0x2f   :  { %431 = vmatpush.bf16.msra.mxu1 %v2028_v5  ;;  %v2197_v38 = vld [vmem:[#allocation6 + $0xf8] sm:$0xf0]  ;;  %v2123_v41 = vld [vmem:[#allocation6 + $0x60] sm:$0xf]  ;;  %v2196_v42 = vor.u32 %v2824_v32, %v2195_v30  ;;  %v2136_v43 = vor.u32 %v2807_v33, %v2133_v34  ;;  %v2806_v44 = vld [vmem:[#allocation6 + $0x64] sm:$0xf0] }
  0x30   :  { %445 = vmatpush.bf16.msra.mxu2 %v1968_v6  ;;  %v2187_v45 = vld [vmem:[#allocation6 + $0xe0] sm:$0xf]  ;;  %v2822_v46 = vld [vmem:[#allocation6 + $0xe4] sm:$0xf0]  ;;  %v2200_v47 = vor.u32 %v2823_v37, %v2197_v38  ;;  %v2805_v48 = vld [vmem:[#allocation6 + $0x64] sm:$0xf]  ;;  %v2124_v54 = vor.u32 %v2806_v44, %v2123_v41 }
  0x31   :  { %459 = vmatpush.bf16.msra.mxu3 %v2032_v10  ;;  %v2125_v49 = vld [vmem:[#allocation6 + $0x68] sm:$0xf0]  ;;  %v2821_v50 = vld [vmem:[#allocation6 + $0xe4] sm:$0xf]  ;;  %v3250_v53 = vld [vmem:[#allocation3 + $0x10] sm:$0xff]  ;;  %v2188_v56 = vor.u32 %v2822_v46, %v2187_v45  ;;  %s3172_s29 = smov [#allocation12]  }
  0x32   :  { %418 = vmatpush.bf16.msra.mxu0 %v1956_v16  ;;  %v2189_v51 = vld [vmem:[#allocation6 + $0xe8] sm:$0xf0]  ;;  %v3248_v52 = vld [vmem:[#allocation3] sm:$0xff]  ;;  %v2115_v55 = vld [vmem:[#allocation6 + $0x50] sm:$0xf]  ;;  %v2128_v57 = vor.u32 %v2805_v48, %v2125_v49  ;;  %s1931_s30 = sshll.u32 %s3172_s29, 4  ;;  %s1932_s30 = int_to_ptr.vmem [resolvable:$true] %s1931_s30 }
  0x33   :  { %432 = vmatpush.bf16.msra.mxu1 %v2020_v19  ;;  %v2804_v58 = vld [vmem:[#allocation6 + $0x54] sm:$0xf0]  ;;  %v2179_v59 = vld [vmem:[#allocation6 + $0xd0] sm:$0xf]  ;;  %v217_v60 = vpack.c.bf16 %v3250_v53, %v3248_v52  ;;  %v3254_v61 = vld [vmem:[#allocation3 + $0x8] sm:$0xff]  ;;  %v2192_v62 = vor.u32 %v2821_v50, %v2189_v51  ;;  %v118_v19 = vlaneseq  ;;  %v149_v32 = vrot.slane %v3248_v52, 7 }
  0x34   :  { %446 = vmatpush.bf16.msra.mxu2 %v1960_v20  ;;  %v2820_v63 = vld [vmem:[#allocation6 + $0xd4] sm:$0xf0]  ;;  %v2803_v0 = vld [vmem:[#allocation6 + $0x54] sm:$0xf]  ;;  %v2117_v1 = vld [vmem:[#allocation6 + $0x58] sm:$0xf0]  ;;  %v2116_v5 = vor.u32 %v2804_v58, %v2115_v55 }
  0x35   :  { %460 = vmatpush.bf16.msra.mxu3 %v2024_v24  ;;  %v2819_v2 = vld [vmem:[#allocation6 + $0xd4] sm:$0xf]  ;;  %v2181_v3 = vld [vmem:[#allocation6 + $0xd8] sm:$0xf0]  ;;  %v2180_v7 = vor.u32 %v2820_v63, %v2179_v59  ;;  %v2120_v8 = vor.u32 %v2803_v0, %v2117_v1  ;;  %v2107_v9 = vld [vmem:[#allocation6 + $0x40] sm:$0xf] }
  0x36   :  { %419 = vmatpush.bf16.msra.mxu0 %v1948_v31  ;;  %v3256_v4 = vld [vmem:[#allocation3 + $0x18] sm:$0xff]  ;;  %v2802_v10 = vld [vmem:[#allocation6 + $0x44] sm:$0xf0]  ;;  %v2171_v11 = vld [vmem:[#allocation6 + $0xc0] sm:$0xf]  ;;  %v2184_v12 = vor.u32 %v2819_v2, %v2181_v3  ;;  %v3261_v31 = vshrl.u32 %v118_v19, 7 }
  0x37   :  { %433 = vmatpush.bf16.msra.mxu1 %v2012_v35  ;;  %v218_v6 = vpack.c.bf16 %v3256_v4, %v3254_v61  ;;  %v2818_v13 = vld [vmem:[#allocation6 + $0xc4] sm:$0xf0]  ;;  %v2801_v14 = vld [vmem:[#allocation6 + $0x44] sm:$0xf]  ;;  %v2109_v15 = vld [vmem:[#allocation6 + $0x48] sm:$0xf0]  ;;  %v2108_v18 = vor.u32 %v2802_v10, %v2107_v9 }
  0x38   :  { %447 = vmatpush.bf16.msra.mxu2 %v1952_v36  ;;  %v2817_v16 = vld [vmem:[#allocation6 + $0xc4] sm:$0xf]  ;;  %v2173_v17 = vld [vmem:[#allocation6 + $0xc8] sm:$0xf0]  ;;  %v2172_v20 = vor.u32 %v2818_v13, %v2171_v11  ;;  %v2112_v21 = vor.u32 %v2801_v14, %v2109_v15  ;;  %v2099_v22 = vld [vmem:[#allocation6 + $0x30] sm:$0xf] }
  0x39   :  { %461 = vmatpush.bf16.msra.mxu3 %v2016_v39  ;;  %420 = vmatmul.bf16.vlgmr.msra.gmra.mxu0 %v217_v60  ;;  %v2800_v23 = vld [vmem:[#allocation6 + $0x34] sm:$0xf0]  ;;  %v2163_v24 = vld [vmem:[#allocation6 + $0xb0] sm:$0xf]  ;;  %v2176_v25 = vor.u32 %v2817_v16, %v2173_v17  ;;  %v2799_v27 = vld [vmem:[#allocation6 + $0x34] sm:$0xf] }
  0x3a   :  { %628 = vmatpush.bf16.msrb.mxu0 %v2132_v40  ;;  %434 = vmatmul.bf16.vlgmr.msra.gmra.mxu1 %v218_v6  ;;  %v2816_v26 = vld [vmem:[#allocation6 + $0xb4] sm:$0xf0]  ;;  %v2101_v28 = vld [vmem:[#allocation6 + $0x38] sm:$0xf0]  ;;  %v2815_v29 = vld [vmem:[#allocation6 + $0xb4] sm:$0xf]  ;;  %v2100_v33 = vor.u32 %v2800_v23, %v2099_v22 }
  0x3b   :  { %642 = vmatpush.bf16.msrb.mxu1 %v2196_v42  ;;  %448 = vmatmul.bf16.vlgmr.msra.gmra.mxu2 %v217_v60  ;;  %v2165_v30 = vld [vmem:[#allocation6 + $0xb8] sm:$0xf0]  ;;  %v2164_v34 = vor.u32 %v2816_v26, %v2163_v24  ;;  %v2104_v35 = vor.u32 %v2799_v27, %v2101_v28  ;;  %v2091_v36 = vld [vmem:[#allocation6 + $0x20] sm:$0xf]  ;;  %v2798_v37 = vld [vmem:[#allocation6 + $0x24] sm:$0xf0] }
  0x3c   :  { %656 = vmatpush.bf16.msrb.mxu2 %v2136_v43  ;;  %462 = vmatmul.bf16.vlgmr.msra.gmra.mxu3 %v218_v6  ;;  %v2155_v38 = vld [vmem:[#allocation6 + $0xa0] sm:$0xf]  ;;  %v2168_v39 = vor.u32 %v2815_v29, %v2165_v30  ;;  %v2814_v40 = vld [vmem:[#allocation6 + $0xa4] sm:$0xf0]  ;;  %v2797_v41 = vld [vmem:[#allocation6 + $0x24] sm:$0xf] }
  0x3d   :  { %670 = vmatpush.bf16.msrb.mxu3 %v2200_v47  ;;  %v2093_v42 = vld [vmem:[#allocation6 + $0x28] sm:$0xf0]  ;;  %v151_v43 = vrot.slane %v3250_v53, 7  ;;  %v150_v44 = vrot.slane %v3254_v61, 7  ;;  %v2813_v45 = vld [vmem:[#allocation6 + $0xa4] sm:$0xf]  ;;  %v2092_v47 = vor.u32 %v2798_v37, %v2091_v36  ;;  %v2156_v51 = vor.u32 %v2814_v40, %v2155_v38 }
  0x3e   :  { %629 = vmatpush.bf16.msrb.mxu0 %v2124_v54  ;;  %v2157_v46 = vld [vmem:[#allocation6 + $0xa8] sm:$0xf0]  ;;  %v2083_v48 = vld [vmem:[#allocation6 + $0x10] sm:$0xf]  ;;  %v2796_v49 = vld [vmem:[#allocation6 + $0x14] sm:$0xf0]  ;;  %v2096_v54 = vor.u32 %v2797_v41, %v2093_v42 }
  0x3f   :  { %643 = vmatpush.bf16.msrb.mxu1 %v2188_v56  ;;  %v2147_v50 = vld [vmem:[#allocation6 + $0x90] sm:$0xf]  ;;  %v2812_v55 = vld [vmem:[#allocation6 + $0x94] sm:$0xf0]  ;;  %v2795_v56 = vld [vmem:[#allocation6 + $0x14] sm:$0xf]  ;;  %v2160_v59 = vor.u32 %v2813_v45, %v2157_v46  ;;  %v2084_v3 = vor.u32 %v2796_v49, %v2083_v48 }
  0x40   :  { %657 = vmatpush.bf16.msrb.mxu2 %v2128_v57  ;;  %v2085_v57 = vld [vmem:[#allocation6 + $0x18] sm:$0xf0]  ;;  %v152_v58 = vrot.slane %v3256_v4, 7  ;;  %v2811_v60 = vld [vmem:[#allocation6 + $0x94] sm:$0xf]  ;;  %v3268_v63 = vadd.s32 8, %v3261_v31 }
  0x41   :  { %671 = vmatpush.bf16.msrb.mxu3 %v2192_v62  ;;  %v2149_v62 = vld [vmem:[#allocation6 + $0x98] sm:$0xf0]  ;;  %v2075_v0 = vld [vmem:[#allocation6] sm:$0xf]  ;;  %v2794_v1 = vld [vmem:[#allocation6 + $0x4] sm:$0xf0]  ;;  %v2088_v9 = vor.u32 %v2795_v56, %v2085_v57 }
  0x42   :  { %630 = vmatpush.bf16.msrb.mxu0 %v2116_v5  ;;  %v2139_v2 = vld [vmem:[#allocation6 + $0x80] sm:$0xf]  ;;  %v2810_v5 = vld [vmem:[#allocation6 + $0x84] sm:$0xf0]  ;;  %v2793_v6 = vld [vmem:[#allocation6 + $0x4] sm:$0xf]  ;;  %v2152_v13 = vor.u32 %v2811_v60, %v2149_v62 }
  0x43   :  { %644 = vmatpush.bf16.msrb.mxu1 %v2180_v7  ;;  %v2077_v7 = vld [vmem:[#allocation6 + $0x8] sm:$0xf0]  ;;  %v2809_v10 = vld [vmem:[#allocation6 + $0x84] sm:$0xf]  ;;  %v2872_v14 = vld [vmem:[#allocation6 + $0x274] sm:$0xf0] }
  0x44   :  { %658 = vmatpush.bf16.msrb.mxu2 %v2120_v8  ;;  %v2148_v8 = vor.u32 %v2812_v55, %v2147_v50  ;;  %v2141_v11 = vld [vmem:[#allocation6 + $0x88] sm:$0xf0]  ;;  %v125_v15 = vand.u32 7, %v3261_v31  ;;  %v132_v16 = vand.u32 7, %v3268_v63  ;;  %vm153_vm0 = vcmp.lt.s32.totalorder %v3261_v31, 1  ;;  %s1933_s13 = sshll.u32 %s3496_s11, 4  ;;  %s1934_s13 = int_to_ptr.hbm [resolvable:$true] %s1933_s13 }
  0x45   :  { %672 = vmatpush.bf16.msrb.mxu3 %v2184_v12  ;;  %v2279_v12 = vld [vmem:[#allocation6 + $0x270] sm:$0xf]  ;;  %v2144_v22 = vor.u32 %v2809_v10, %v2141_v11  ;;  %v2888_v23 = vld [vmem:[#allocation6 + $0x2f4] sm:$0xf0]  ;;  %v2871_v24 = vld [vmem:[#allocation6 + $0x274] sm:$0xf]  ;;  %v154_v29 = vsel %vm153_vm0, %v149_v32, %v151_v43  ;;  %v156_v30 = vsel %vm153_vm0, %v151_v43, %v149_v32  ;;  %v157_v32 = vsel %vm153_vm0, %v152_v58, %v150_v44 }
  0x46   :  { %631 = vmatpush.bf16.msrb.mxu0 %v2108_v18  ;;  %v2343_v17 = vld [vmem:[#allocation6 + $0x2f0] sm:$0xf]  ;;  %v2076_v18 = vor.u32 %v2794_v1, %v2075_v0  ;;  %v2280_v26 = vor.u32 %v2872_v14, %v2279_v12  ;;  %v2887_v27 = vld [vmem:[#allocation6 + $0x2f4] sm:$0xf]  ;;  %v2345_v28 = vld [vmem:[#allocation6 + $0x2f8] sm:$0xf0]  ;;  %v2204_v42 = vpack.c.bf16 %v154_v29, %v156_v30 }
  0x47   :  { %645 = vmatpush.bf16.msrb.mxu1 %v2172_v20  ;;  %v2140_v20 = vor.u32 %v2810_v5, %v2139_v2  ;;  %vm3283_vm1 = vcmp.ne.s32.totalorder %v132_v16, 0  ;;  %vm3289_vm2 = vcmp.ne.s32.totalorder %v125_v15, 0  ;;  %v2344_v36 = vor.u32 %v2888_v23, %v2343_v17  ;;  %v2271_v38 = vld [vmem:[#allocation6 + $0x260] sm:$0xf]  ;;  %v2886_v43 = vld [vmem:[#allocation6 + $0x2e4] sm:$0xf0] }
  0x48   :  { %659 = vmatpush.bf16.msrb.mxu2 %v2112_v21  ;;  %v2080_v21 = vor.u32 %v2793_v6, %v2077_v7  ;;  %v2335_v40 = vld [vmem:[#allocation6 + $0x2e0] sm:$0xf]  ;;  %v2348_v41 = vor.u32 %v2887_v27, %v2345_v28  ;;  %v2869_v45 = vld [vmem:[#allocation6 + $0x264] sm:$0xf]  ;;  %v2273_v46 = vld [vmem:[#allocation6 + $0x268] sm:$0xf0] }
  0x49   :  { %673 = vmatpush.bf16.msrb.mxu3 %v2176_v25  ;;  %v2281_v25 = vld [vmem:[#allocation6 + $0x278] sm:$0xf0]  ;;  %vm3305_vm3 = vmpackc.low %vm3283_vm1, %vm3289_vm2  ;;  %v2885_v48 = vld [vmem:[#allocation6 + $0x2e4] sm:$0xf]  ;;  %vm170_vm4 = vcmp.lt.s32.totalorder %v3261_v31, 7  ;;  %vm2987_vm5 = vcmp.ne.s32.totalorder %v132_v16, 7 }
  0x4a   :  { %632 = vmatpush.bf16.msrb.mxu0 %v2100_v33  ;;  %v2284_v37 = vor.u32 %v2871_v24, %v2281_v25  ;;  %v2337_v49 = vld [vmem:[#allocation6 + $0x2e8] sm:$0xf0]  ;;  %v2263_v55 = vld [vmem:[#allocation6 + $0x250] sm:$0xf]  ;;  %v2868_v56 = vld [vmem:[#allocation6 + $0x254] sm:$0xf0] }
  0x4b   :  { %646 = vmatpush.bf16.msrb.mxu1 %v2164_v34  ;;  %v2327_v57 = vld [vmem:[#allocation6 + $0x2d0] sm:$0xf]  ;;  %v2867_v60 = vld [vmem:[#allocation6 + $0x254] sm:$0xf]  ;;  %v2265_v62 = vld [vmem:[#allocation6 + $0x258] sm:$0xf0]  ;;  %v2264_v2 = vor.u32 %v2868_v56, %v2263_v55 }
  0x4c   :  { %660 = vmatpush.bf16.msrb.mxu2 %v2104_v35  ;;  %v155_v35 = vsel %vm153_vm0, %v150_v44, %v152_v58  ;;  %v2340_v58 = vor.u32 %v2885_v48, %v2337_v49  ;;  %v2883_v0 = vld [vmem:[#allocation6 + $0x2d4] sm:$0xf]  ;;  %v2329_v1 = vld [vmem:[#allocation6 + $0x2d8] sm:$0xf0]  ;;  %v2268_v5 = vor.u32 %v2867_v60, %v2265_v62  ;;  %v2255_v6 = vld [vmem:[#allocation6 + $0x240] sm:$0xf] }
  0x4d   :  { %674 = vmatpush.bf16.msrb.mxu3 %v2168_v39  ;;  %v2870_v39 = vld [vmem:[#allocation6 + $0x264] sm:$0xf0]  ;;  %v2209_v44 = vpack.c.bf16 %v155_v35, %v157_v32  ;;  %v2865_v11 = vld [vmem:[#allocation6 + $0x244] sm:$0xf]  ;;  %v2257_v12 = vld [vmem:[#allocation6 + $0x248] sm:$0xf0] }
  0x4e   :  { %633 = vmatpush.bf16.msrb.mxu0 %v2092_v47  ;;  %v2272_v50 = vor.u32 %v2870_v39, %v2271_v38  ;;  %v2866_v7 = vld [vmem:[#allocation6 + $0x244] sm:$0xf0]  ;;  %v2321_v14 = vld [vmem:[#allocation6 + $0x2c8] sm:$0xf0]  ;;  %v2311_v23 = vld [vmem:[#allocation6 + $0x2b0] sm:$0xf] }
  0x4f   :  { %647 = vmatpush.bf16.msrb.mxu1 %v2156_v51  ;;  %v2336_v51 = vor.u32 %v2886_v43, %v2335_v40  ;;  %v2882_v10 = vld [vmem:[#allocation6 + $0x2c4] sm:$0xf0]  ;;  %v2256_v17 = vor.u32 %v2866_v7, %v2255_v6  ;;  %v2880_v25 = vld [vmem:[#allocation6 + $0x2b4] sm:$0xf0]  ;;  %v2249_v27 = vld [vmem:[#allocation6 + $0x238] sm:$0xf0] }
  0x50   :  { %661 = vmatpush.bf16.msrb.mxu2 %v2096_v54  ;;  %v2276_v54 = vor.u32 %v2869_v45, %v2273_v46  ;;  %v2879_v28 = vld [vmem:[#allocation6 + $0x2b4] sm:$0xf]  ;;  %v2313_v29 = vld [vmem:[#allocation6 + $0x2b8] sm:$0xf0]  ;;  %v2312_v33 = vor.u32 %v2880_v25, %v2311_v23  ;;  %v2239_v35 = vld [vmem:[#allocation6 + $0x220] sm:$0xf] }
  0x51   :  { %675 = vmatpush.bf16.msrb.mxu3 %v2160_v59  ;;  %v2884_v59 = vld [vmem:[#allocation6 + $0x2d4] sm:$0xf0]  ;;  %v2862_v32 = vld [vmem:[#allocation6 + $0x224] sm:$0xf0]  ;;  %v2861_v39 = vld [vmem:[#allocation6 + $0x224] sm:$0xf] }
  0x52   :  { %634 = vmatpush.bf16.msrb.mxu0 %v2084_v3  ;;  %v2328_v3 = vor.u32 %v2884_v59, %v2327_v57  ;;  %v2878_v38 = vld [vmem:[#allocation6 + $0x2a4] sm:$0xf0]  ;;  %v2241_v40 = vld [vmem:[#allocation6 + $0x228] sm:$0xf0]  ;;  %v2240_v43 = vor.u32 %v2862_v32, %v2239_v35  ;;  %v2860_v48 = vld [vmem:[#allocation6 + $0x214] sm:$0xf0] }
  0x53   :  { %648 = vmatpush.bf16.msrb.mxu1 %v2148_v8  ;;  %v2319_v8 = vld [vmem:[#allocation6 + $0x2c0] sm:$0xf]  ;;  %v2244_v46 = vor.u32 %v2861_v39, %v2241_v40  ;;  %v2295_v49 = vld [vmem:[#allocation6 + $0x290] sm:$0xf]  ;;  %v2233_v55 = vld [vmem:[#allocation6 + $0x218] sm:$0xf0] }
  0x54   :  { %662 = vmatpush.bf16.msrb.mxu2 %v2088_v9  ;;  %v2332_v9 = vor.u32 %v2883_v0, %v2329_v1  ;;  %v166_v56 = vrot.slane %v3248_v52, 1  ;;  %v168_v57 = vrot.slane %v3250_v53, 1  ;;  %v2297_v59 = vld [vmem:[#allocation6 + $0x298] sm:$0xf0]  ;;  %v167_v60 = vrot.slane %v3254_v61, 1 }
  0x55   :  { %676 = vmatpush.bf16.msrb.mxu3 %v2152_v13  ;;  %v2881_v13 = vld [vmem:[#allocation6 + $0x2c4] sm:$0xf]  ;;  %v169_v62 = vrot.slane %v3256_v4, 1  ;;  %v2287_v6 = vld [vmem:[#allocation6 + $0x280] sm:$0xf]  ;;  %vm2988_vm6 = vcmp.ne.s32.totalorder %v125_v15, 7 }
  0x56   :  { %635 = vmatpush.bf16.msrb.mxu0 %v2076_v18  ;;  %v2320_v18 = vor.u32 %v2882_v10, %v2319_v8  ;;  %v2324_v24 = vor.u32 %v2881_v13, %v2321_v14  ;;  %v2874_v53 = vld [vmem:[#allocation6 + $0x284] sm:$0xf0]  ;;  %v2857_v7 = vld [vmem:[#allocation6 + $0x204] sm:$0xf]  ;;  %v2225_v8 = vld [vmem:[#allocation6 + $0x208] sm:$0xf0]  ;;  %v173_v4 = vsel %vm170_vm4, %v168_v57, %v166_v56 }
  0x57   :  { %649 = vmatpush.bf16.msrb.mxu1 %v2140_v20  ;;  %v2260_v20 = vor.u32 %v2865_v11, %v2257_v12  ;;  %v2873_v61 = vld [vmem:[#allocation6 + $0x284] sm:$0xf]  ;;  %v2289_v10 = vld [vmem:[#allocation6 + $0x288] sm:$0xf0]  ;;  %v172_v11 = vsel %vm170_vm4, %v167_v60, %v169_v62  ;;  %v174_v12 = vsel %vm170_vm4, %v169_v62, %v167_v60  ;;  %v2288_v14 = vor.u32 %v2874_v53, %v2287_v6  ;;  %vm3334_vm7 = vmpackc.low %vm2987_vm5, %vm2988_vm6 }
  0x58   :  { %663 = vmatpush.bf16.msrb.mxu2 %v2080_v21  ;;  %v2247_v21 = vld [vmem:[#allocation6 + $0x230] sm:$0xf]  ;;  %vm1921_vm5 = vcmask 130112   ;;  %vm1924_vm6 = vcmask 122880  }
  0x59   :  { %677 = vmatpush.bf16.msrb.mxu3 %v2144_v22  ;;  %2205 = vmatmul.msk.bf16.vlgmr.msrb.gmra.mxu0 %vm3305_vm3, %v2204_v42  ;;  %v2864_v22 = vld [vmem:[#allocation6 + $0x234] sm:$0xf0] }
  0x5a   :  { %879 = vmatpush.bf16.msra.mxu0 %v2280_v26  ;;  %2210 = vmatmul.msk.bf16.vlgmr.msrb.gmra.mxu1 %vm3305_vm3, %v2209_v44  ;;  %v2863_v26 = vld [vmem:[#allocation6 + $0x234] sm:$0xf]  ;;  %v2248_v30 = vor.u32 %v2864_v22, %v2247_v21  ;;  %v2357_v21 = vpack.c.bf16 %v174_v12, %v172_v11 }
  0x5b   :  { %893 = vmatpush.bf16.msra.mxu1 %v2344_v36  ;;  %2215 = vmatmul.msk.bf16.vlgmr.msrb.gmra.mxu2 %vm3305_vm3, %v2204_v42  ;;  %v2252_v34 = vor.u32 %v2863_v26, %v2249_v27  ;;  %v2303_v36 = vld [vmem:[#allocation6 + $0x2a0] sm:$0xf]  ;;  %v2305_v42 = vld [vmem:[#allocation6 + $0x2a8] sm:$0xf0] }
  0x5c   :  { %907 = vmatpush.bf16.msra.mxu2 %v2284_v37  ;;  %2220 = vmatmul.msk.bf16.vlgmr.msrb.gmra.mxu3 %vm3305_vm3, %v2209_v44  ;;  %v2316_v37 = vor.u32 %v2879_v28, %v2313_v29  ;;  %v2304_v45 = vor.u32 %v2878_v38, %v2303_v36  ;;  %v2231_v44 = vld [vmem:[#allocation6 + $0x210] sm:$0xf] }
  0x5d   :  { %921 = vmatpush.bf16.msra.mxu3 %v2348_v41  ;;  %v2877_v41 = vld [vmem:[#allocation6 + $0x2a4] sm:$0xf]  ;;  %v2232_v0 = vor.u32 %v2860_v48, %v2231_v44 }
  0x5e   :  { %880 = vmatpush.bf16.msra.mxu0 %v2272_v50  ;;  %v2308_v50 = vor.u32 %v2877_v41, %v2305_v42 }
  0x5f   :  { %894 = vmatpush.bf16.msra.mxu1 %v2336_v51  ;;  %v2876_v51 = vld [vmem:[#allocation6 + $0x294] sm:$0xf0] }
  0x60   :  { %908 = vmatpush.bf16.msra.mxu2 %v2276_v54  ;;  %v2859_v54 = vld [vmem:[#allocation6 + $0x214] sm:$0xf]  ;;  %v2296_v1 = vor.u32 %v2876_v51, %v2295_v49 }
  0x61   :  { %922 = vmatpush.bf16.msra.mxu3 %v2340_v58  ;;  %v2875_v58 = vld [vmem:[#allocation6 + $0x294] sm:$0xf] }
  0x62   :  { %881 = vmatpush.bf16.msra.mxu0 %v2264_v2  ;;  %v2236_v2 = vor.u32 %v2859_v54, %v2233_v55  ;;  %v2300_v52 = vor.u32 %v2875_v58, %v2297_v59 }
  0x63   :  { %895 = vmatpush.bf16.msra.mxu1 %v2328_v3  ;;  %v2223_v3 = vld [vmem:[#allocation6 + $0x200] sm:$0xf] }
  0x64   :  { %909 = vmatpush.bf16.msra.mxu2 %v2268_v5  ;;  %v2858_v5 = vld [vmem:[#allocation6 + $0x204] sm:$0xf0] }
  0x65   :  { %923 = vmatpush.bf16.msra.mxu3 %v2332_v9  ;;  %v171_v9 = vsel %vm170_vm4, %v166_v56, %v168_v57  ;;  %v2224_v13 = vor.u32 %v2858_v5, %v2223_v3 }
  0x66   :  { %882 = vmatpush.bf16.msra.mxu0 %v2256_v17  ;;  %v2228_v17 = vor.u32 %v2857_v7, %v2225_v8 }
  0x67   :  { %896 = vmatpush.bf16.msra.mxu1 %v2320_v18  ;;  %v2292_v18 = vor.u32 %v2873_v61, %v2289_v10 }
  0x68   :  { %910 = vmatpush.bf16.msra.mxu2 %v2260_v20  ;;  %v2352_v20 = vpack.c.bf16 %v173_v4, %v171_v9 }
  0x69   :  { %924 = vmatpush.bf16.msra.mxu3 %v2324_v24 }
  0x6a   :  { %883 = vmatpush.bf16.msra.mxu0 %v2248_v30 }
  0x6b   :  { %897 = vmatpush.bf16.msra.mxu1 %v2312_v33 }
  0x6c   :  { %911 = vmatpush.bf16.msra.mxu2 %v2252_v34 }
  0x6d   :  { %925 = vmatpush.bf16.msra.mxu3 %v2316_v37 }
  0x6e   :  { %884 = vmatpush.bf16.msra.mxu0 %v2240_v43  ;;  %v939_v43 = vld [vmem:[%s3487_s2] sm:$0x3] }
  0x6f   :  { %898 = vmatpush.bf16.msra.mxu1 %v2304_v45  ;;  %v942_v59 = vperm.slane %v939_v43, 1 }
  0x70   :  { %912 = vmatpush.bf16.msra.mxu2 %v2244_v46 }
  0x71   :  { %926 = vmatpush.bf16.msra.mxu3 %v2308_v50  ;;  %v941_v50 = vperm.slane %v939_v43, 0 }
  0x72   :  { %885 = vmatpush.bf16.msra.mxu0 %v2232_v0 }
  0x73   :  { %899 = vmatpush.bf16.msra.mxu1 %v2296_v1 }
  0x74   :  { %913 = vmatpush.bf16.msra.mxu2 %v2236_v2 }
  0x75   :  { %927 = vmatpush.bf16.msra.mxu3 %v2300_v52 }
  0x76   :  { %886 = vmatpush.bf16.msra.mxu0 %v2224_v13 }
  0x77   :  { %900 = vmatpush.bf16.msra.mxu1 %v2288_v14 }
  0x78   :  { %914 = vmatpush.bf16.msra.mxu2 %v2228_v17 }
  0x79   :  { %928 = vmatpush.bf16.msra.mxu3 %v2292_v18  ;;  %2353 = vmatmul.msk.bf16.vlgmr.msra.gmra.mxu0 %vm3334_vm7, %v2352_v20  ;;  %v3171_v18 = vmov 256.0  }
  0x7a   :  { %2358 = vmatmul.msk.bf16.vlgmr.msra.gmra.mxu1 %vm3334_vm7, %v2357_v21  ;;  %3000 = vrcp.f32 %v3171_v18 }
  0x7b   :  { %2363 = vmatmul.msk.bf16.vlgmr.msra.gmra.mxu2 %vm3334_vm7, %v2352_v20 }
  0x7c   :  { %2368 = vmatmul.msk.bf16.vlgmr.msra.gmra.mxu3 %vm3334_vm7, %v2357_v21 }
  0x80   :  { %v3369_v20 = vpop.eup %3000 }
  0x81   :  { %v962_v21 = vmul.f32 256.0, %v3369_v20  ;;  %vm966_vm8 = vweird.f32 %v3369_v20 }
  0xb6   :  { %v421_v63 = vpop.f32.mrf.mxu0 }
  0xb7   :  { %v435_v15 = vpop.f32.mrf.mxu1 }
  0xb8   :  { %v436_v32 = vadd.f32 %v435_v15, %v421_v63  ;;  %v963_v63 = vsub.f32 1.0, %v962_v21  ;;  %v2427_v15 = vld [vmem:[#allocation9 + $0x170] sm:$0xf] }
  0xb9   :  { %v2395_v21 = vld [vmem:[#allocation9 + $0x130] sm:$0xf] }
  0xba   :  { %v964_v43 = vmul.f32 %v3369_v20, %v963_v63  ;;  %v2928_v63 = vld [vmem:[#allocation9 + $0x134] sm:$0xf0] }
  0xbe   :  { %v449_v16 = vpop.f32.mrf.mxu2  ;;  %v423_v24 = vpop.f32.mrf.mxu0 }
  0xbf   :  { %v463_v23 = vpop.f32.mrf.mxu3  ;;  %v437_v25 = vpop.f32.mrf.mxu1 }
  0xc0   :  { %v464_v39 = vadd.f32 %v463_v23, %v449_v16  ;;  %v438_v44 = vadd.f32 %v437_v25, %v423_v24  ;;  %v2936_v16 = vld [vmem:[#allocation9 + $0x174] sm:$0xf0]  ;;  %v2491_v23 = vld [vmem:[#allocation9 + $0x1f0] sm:$0xf] }
  0xc1   :  { %v2428_v24 = vor.u32 %v2936_v16, %v2427_v15  ;;  %v2952_v25 = vld [vmem:[#allocation9 + $0x1f4] sm:$0xf0]  ;;  %v2459_v15 = vld [vmem:[#allocation9 + $0x1b0] sm:$0xf] }
  0xc3   :  { %1283 = vmatpush.bf16.msrb.mxu0 %v2428_v24  ;;  %v2944_v24 = vld [vmem:[#allocation9 + $0x1b4] sm:$0xf0] }
  0xc6   :  { %v451_v26 = vpop.f32.mrf.mxu2 }
  0xc7   :  { %v465_v27 = vpop.f32.mrf.mxu3 }
  0xc8   :  { %v466_v60 = vadd.f32 %v465_v27, %v451_v26  ;;  %v2935_v26 = vld [vmem:[#allocation9 + $0x174] sm:$0xf]  ;;  %v2429_v27 = vld [vmem:[#allocation9 + $0x178] sm:$0xf0] }
  0xd6   :  { %v637_v28 = vpop.f32.mrf.mxu0 }
  0xd7   :  { %v651_v29 = vpop.f32.mrf.mxu1  ;;  %v638_v40 = vadd.f32 %v637_v28, %v436_v32  ;;  %v2492_v28 = vor.u32 %v2952_v25, %v2491_v23  ;;  %v2934_v32 = vld [vmem:[#allocation9 + $0x164] sm:$0xf0]  ;;  %v2927_v25 = vld [vmem:[#allocation9 + $0x134] sm:$0xf] }
  0xd9   :  { %v652_v45 = vadd.f32 %v651_v29, %v638_v40  ;;  %v2432_v29 = vor.u32 %v2935_v26, %v2429_v27  ;;  %1297 = vmatpush.bf16.msrb.mxu1 %v2492_v28  ;;  %v2933_v40 = vld [vmem:[#allocation9 + $0x164] sm:$0xf]  ;;  %v2397_v26 = vld [vmem:[#allocation9 + $0x138] sm:$0xf0]  ;;  %v2943_v27 = vld [vmem:[#allocation9 + $0x1b4] sm:$0xf] }
  0xda   :  { %v2461_v28 = vld [vmem:[#allocation9 + $0x1b8] sm:$0xf0] }
  0xdb   :  { %1311 = vmatpush.bf16.msrb.mxu2 %v2432_v29 }
  0xde   :  { %v665_v30 = vpop.f32.mrf.mxu2  ;;  %v639_v34 = vpop.f32.mrf.mxu0 }
  0xdf   :  { %v679_v33 = vpop.f32.mrf.mxu3  ;;  %v653_v35 = vpop.f32.mrf.mxu1  ;;  %v666_v46 = vadd.f32 %v665_v30, %v464_v39  ;;  %v640_v55 = vadd.f32 %v639_v34, %v438_v44  ;;  %v2951_v30 = vld [vmem:[#allocation9 + $0x1f4] sm:$0xf]  ;;  %v2419_v34 = vld [vmem:[#allocation9 + $0x160] sm:$0xf]  ;;  %v2411_v44 = vld [vmem:[#allocation9 + $0x150] sm:$0xf] }
  0xe1   :  { %v680_v56 = vadd.f32 %v679_v33, %v666_v46  ;;  %v654_v2 = vadd.f32 %v653_v35, %v640_v55  ;;  %v2493_v33 = vld [vmem:[#allocation9 + $0x1f8] sm:$0xf0]  ;;  %v2485_v46 = vld [vmem:[#allocation9 + $0x1e8] sm:$0xf0] }
  0xe2   :  { %v2496_v35 = vor.u32 %v2951_v30, %v2493_v33  ;;  %v2396_v30 = vor.u32 %v2928_v63, %v2395_v21  ;;  %v2937_v63 = vld [vmem:[#allocation9 + $0x184] sm:$0xf] }
  0xe4   :  { %1325 = vmatpush.bf16.msrb.mxu3 %v2496_v35  ;;  %v2400_v35 = vor.u32 %v2927_v25, %v2397_v26  ;;  %v2904_v25 = vld [vmem:[#allocation9 + $0x74] sm:$0xf0]  ;;  %v2619_v26 = vld [vmem:[#allocation9 + $0xf0] sm:$0xf] }
  0xe6   :  { %v667_v36 = vpop.f32.mrf.mxu2 }
  0xe7   :  { %v681_v37 = vpop.f32.mrf.mxu3  ;;  %v668_v3 = vadd.f32 %v667_v36, %v466_v60  ;;  %v2483_v36 = vld [vmem:[#allocation9 + $0x1e0] sm:$0xf] }
  0xe9   :  { %v682_v9 = vadd.f32 %v681_v37, %v668_v3  ;;  %v2950_v37 = vld [vmem:[#allocation9 + $0x1e4] sm:$0xf0]  ;;  %v965_v3 = vadd.f32 %v3369_v20, %v964_v43  ;;  %v2387_v43 = vld [vmem:[#allocation9 + $0x120] sm:$0xf] }
  0xea   :  { %v2484_v39 = vor.u32 %v2950_v37, %v2483_v36 }
  0xeb   :  { %v3376_v16 = vsel %vm966_vm8, %v3369_v20, %v965_v3  ;;  %v2445_v3 = vld [vmem:[#allocation9 + $0x198] sm:$0xf0] }
  0xec   :  { %1298 = vmatpush.bf16.msrb.mxu1 %v2484_v39 }
  0xf6   :  { %v888_v38 = vpop.f32.mrf.mxu0 }
  0xf7   :  { %v902_v41 = vpop.f32.mrf.mxu1 }
  0xf8   :  { %v903_v42 = vadd.f32 %v902_v41, %v888_v38  ;;  %v2420_v38 = vor.u32 %v2934_v32, %v2419_v34  ;;  %v2421_v41 = vld [vmem:[#allocation9 + $0x168] sm:$0xf0]  ;;  %v2460_v34 = vor.u32 %v2944_v24, %v2459_v15  ;;  %v2464_v32 = vor.u32 %v2943_v27, %v2461_v28  ;;  %v2920_v27 = vld [vmem:[#allocation9 + $0xf4] sm:$0xf0] }
  0xf9   :  { %v2437_v15 = vld [vmem:[#allocation9 + $0x188] sm:$0xf0] }
  0xfa   :  { %v935_v48 = vadd.f32 %v903_v42, %v652_v45  ;;  %v2949_v42 = vld [vmem:[#allocation9 + $0x1e4] sm:$0xf]  ;;  %v2424_v45 = vor.u32 %v2933_v40, %v2421_v41  ;;  %1284 = vmatpush.bf16.msrb.mxu0 %v2420_v38  ;;  %v2440_v24 = vor.u32 %v2937_v63, %v2437_v15  ;;  %v2912_v63 = vld [vmem:[#allocation9 + $0xb4] sm:$0xf0]  ;;  %v2895_v15 = vld [vmem:[#allocation9 + $0x34] sm:$0xf] }
  0xfc   :  { %v3349_v1 = vadd.f32 %v941_v50, %v935_v48  ;;  %v2932_v48 = vld [vmem:[#allocation9 + $0x154] sm:$0xf0]  ;;  %1312 = vmatpush.bf16.msrb.mxu2 %v2424_v45  ;;  %v2926_v45 = vld [vmem:[#allocation9 + $0x124] sm:$0xf0] }
  0xfd   :  { %v2412_v55 = vor.u32 %v2932_v48, %v2411_v44  ;;  %v2388_v44 = vor.u32 %v2926_v45, %v2387_v43  ;;  %v2942_v48 = vld [vmem:[#allocation9 + $0x1a4] sm:$0xf0]  ;;  %v2549_v43 = vld [vmem:[#allocation9 + $0x68] sm:$0xf0]  ;;  %v2917_v45 = vld [vmem:[#allocation9 + $0xe4] sm:$0xf] }
  0xfe   :  { %v916_v49 = vpop.f32.mrf.mxu2  ;;  %v890_v54 = vpop.f32.mrf.mxu0  ;;  %v949_v53 = vmax.f32 %v3349_v1, 0.0 }
  0xff   :  { %v930_v51 = vpop.f32.mrf.mxu3  ;;  %v904_v58 = vpop.f32.mrf.mxu1  ;;  %1285 = vmatpush.bf16.msrb.mxu0 %v2412_v55  ;;  %v2924_v55 = vld [vmem:[#allocation9 + $0x114] sm:$0xf0] }
 0x100   :  { %v931_v57 = vadd.f32 %v930_v51, %v916_v49  ;;  %v905_v0 = vadd.f32 %v904_v58, %v890_v54  ;;  %v2488_v49 = vor.u32 %v2949_v42, %v2485_v46  ;;  %v2948_v51 = vld [vmem:[#allocation9 + $0x1d4] sm:$0xf0]  ;;  %v2931_v54 = vld [vmem:[#allocation9 + $0x154] sm:$0xf]  ;;  %v2477_v58 = vld [vmem:[#allocation9 + $0x1d8] sm:$0xf0] }
 0x101   :  { %v2451_v46 = vld [vmem:[#allocation9 + $0x1a0] sm:$0xf] }
 0x102   :  { %v936_v62 = vadd.f32 %v931_v57, %v680_v56  ;;  %v937_v6 = vadd.f32 %v905_v0, %v654_v2  ;;  %v2413_v56 = vld [vmem:[#allocation9 + $0x158] sm:$0xf0]  ;;  %v2947_v57 = vld [vmem:[#allocation9 + $0x1d4] sm:$0xf]  ;;  %v2930_v0 = vld [vmem:[#allocation9 + $0x144] sm:$0xf0]  ;;  %1326 = vmatpush.bf16.msrb.mxu3 %v2488_v49  ;;  %v2452_v49 = vor.u32 %v2942_v48, %v2451_v46 }
 0x103   :  { %v2416_v60 = vor.u32 %v2931_v54, %v2413_v56  ;;  %v2467_v2 = vld [vmem:[#allocation9 + $0x1c0] sm:$0xf]  ;;  %v2379_v54 = vld [vmem:[#allocation9 + $0x110] sm:$0xf]  ;;  %v2613_v46 = vld [vmem:[#allocation9 + $0xe8] sm:$0xf0] }
 0x104   :  { %v3351_v5 = vadd.f32 %v942_v59, %v936_v62  ;;  %v3359_v11 = vadd.f32 %v941_v50, %v937_v6  ;;  %v2475_v50 = vld [vmem:[#allocation9 + $0x1d0] sm:$0xf]  ;;  %v2403_v62 = vld [vmem:[#allocation9 + $0x140] sm:$0xf]  ;;  %v2480_v6 = vor.u32 %v2947_v57, %v2477_v58  ;;  %v2380_v57 = vor.u32 %v2924_v55, %v2379_v54  ;;  %v2940_v58 = vld [vmem:[#allocation9 + $0x194] sm:$0xf0] }
 0x105   :  { %1313 = vmatpush.bf16.msrb.mxu2 %v2416_v60  ;;  %v2443_v56 = vld [vmem:[#allocation9 + $0x190] sm:$0xf]  ;;  %v2381_v60 = vld [vmem:[#allocation9 + $0x118] sm:$0xf0]  ;;  %v2616_v48 = vor.u32 %v2917_v45, %v2613_v46 }
 0x106   :  { %v918_v52 = vpop.f32.mrf.mxu2  ;;  %v950_v7 = vmax.f32 %v3351_v5, 0.0  ;;  %v951_v13 = vmax.f32 %v3359_v11, 0.0  ;;  %1327 = vmatpush.bf16.msrb.mxu3 %v2480_v6  ;;  %v2925_v11 = vld [vmem:[#allocation9 + $0x124] sm:$0xf]  ;;  %v2571_v45 = vld [vmem:[#allocation9 + $0x90] sm:$0xf] }
 0x107   :  { %v932_v8 = vpop.f32.mrf.mxu3 }
 0x108   :  { %v933_v61 = vadd.f32 %v932_v8, %v918_v52  ;;  %v955_v10 = vadd.f32 %v950_v7, %v949_v53  ;;  %v2946_v52 = vld [vmem:[#allocation9 + $0x1c4] sm:$0xf0]  ;;  %v2929_v8 = vld [vmem:[#allocation9 + $0x144] sm:$0xf] }
 0x10a   :  { %v938_v4 = vadd.f32 %v933_v61, %v682_v9  ;;  %956 = vadd.xlane.f32.xlu0 %v955_v10  ;;  %v2405_v9 = vld [vmem:[#allocation9 + $0x148] sm:$0xf0]  ;;  %v2945_v61 = vld [vmem:[#allocation9 + $0x1c4] sm:$0xf] }
 0x10b   :  { %v2469_v10 = vld [vmem:[#allocation9 + $0x1c8] sm:$0xf0]  ;;  %v2408_v18 = vor.u32 %v2929_v8, %v2405_v9  ;;  %v2922_v8 = vld [vmem:[#allocation9 + $0x104] sm:$0xf0]  ;;  %v2435_v9 = vld [vmem:[#allocation9 + $0x180] sm:$0xf] }
 0x10c   :  { %v3361_v12 = vadd.f32 %v942_v59, %v938_v4  ;;  %v2476_v59 = vor.u32 %v2948_v51, %v2475_v50  ;;  %v2404_v4 = vor.u32 %v2930_v0, %v2403_v62  ;;  %v2472_v23 = vor.u32 %v2945_v61, %v2469_v10  ;;  %v2938_v10 = vld [vmem:[#allocation9 + $0x184] sm:$0xf0] }
 0x10d   :  { %1314 = vmatpush.bf16.msrb.mxu2 %v2408_v18  ;;  %v2444_v62 = vor.u32 %v2940_v58, %v2443_v56  ;;  %v2436_v18 = vor.u32 %v2938_v10, %v2435_v9  ;;  %v2915_v56 = vld [vmem:[#allocation9 + $0xd4] sm:$0xf]  ;;  %v2913_v9 = vld [vmem:[#allocation9 + $0xc4] sm:$0xf] }
 0x10e   :  { %v952_v14 = vmax.f32 %v3361_v12, 0.0  ;;  %1299 = vmatpush.bf16.msrb.mxu1 %v2476_v59  ;;  %1286 = vmatpush.bf16.msrb.mxu0 %v2404_v4  ;;  %v2941_v12 = vld [vmem:[#allocation9 + $0x1a4] sm:$0xf]  ;;  %v2923_v59 = vld [vmem:[#allocation9 + $0x114] sm:$0xf] }
 0x10f   :  { %1328 = vmatpush.bf16.msrb.mxu3 %v2472_v23  ;;  %v2384_v0 = vor.u32 %v2923_v59, %v2381_v60  ;;  %v2921_v4 = vld [vmem:[#allocation9 + $0x104] sm:$0xf]  ;;  %v2555_v23 = vld [vmem:[#allocation9 + $0x70] sm:$0xf]  ;;  %v2531_v59 = vld [vmem:[#allocation9 + $0x40] sm:$0xf] }
 0x110   :  { %v958_v17 = vadd.f32 %v952_v14, %v951_v13  ;;  %v2556_v28 = vor.u32 %v2904_v25, %v2555_v23  ;;  %v2898_v60 = vld [vmem:[#allocation9 + $0x44] sm:$0xf0]  ;;  %v2525_v23 = vld [vmem:[#allocation9 + $0x38] sm:$0xf0] }
 0x111   :  { %1315 = vmatpush.bf16.msrb.mxu2 %v2400_v35  ;;  %v2528_v25 = vor.u32 %v2895_v15, %v2525_v23 }
 0x112   :  { %959 = vadd.xlane.f32.xlu0 %v958_v17  ;;  %v2468_v17 = vor.u32 %v2946_v52, %v2467_v2  ;;  %1287 = vmatpush.bf16.msrb.mxu0 %v2396_v30  ;;  %v2939_v2 = vld [vmem:[#allocation9 + $0x194] sm:$0xf]  ;;  %v2371_v52 = vld [vmem:[#allocation9 + $0x100] sm:$0xf] }
 0x113   :  { %1329 = vmatpush.bf16.msrb.mxu3 %v2464_v32  ;;  %v2448_v6 = vor.u32 %v2939_v2, %v2445_v3  ;;  %v2372_v61 = vor.u32 %v2922_v8, %v2371_v52  ;;  %v2903_v30 = vld [vmem:[#allocation9 + $0x74] sm:$0xf]  ;;  %v2621_v32 = vld [vmem:[#allocation9 + $0xf8] sm:$0xf0]  ;;  %v2914_v2 = vld [vmem:[#allocation9 + $0xc4] sm:$0xf0] }
 0x114   :  { %1300 = vmatpush.bf16.msrb.mxu1 %v2468_v17  ;;  %v2373_v17 = vld [vmem:[#allocation9 + $0x108] sm:$0xf0]  ;;  %v2897_v3 = vld [vmem:[#allocation9 + $0x44] sm:$0xf] }
 0x115   :  { %v2376_v21 = vor.u32 %v2921_v4, %v2373_v17  ;;  %v2523_v4 = vld [vmem:[#allocation9 + $0x30] sm:$0xf]  ;;  %v2896_v17 = vld [vmem:[#allocation9 + $0x34] sm:$0xf0] }
 0x116   :  { %1288 = vmatpush.bf16.msrb.mxu0 %v2388_v44 }
 0x118   :  { %1301 = vmatpush.bf16.msrb.mxu1 %v2460_v34  ;;  %v2919_v34 = vld [vmem:[#allocation9 + $0xf4] sm:$0xf] }
 0x11a   :  { %1289 = vmatpush.bf16.msrb.mxu0 %v2380_v57  ;;  %v2605_v57 = vld [vmem:[#allocation9 + $0xd8] sm:$0xf0] }
 0x11b   :  { %v2608_v58 = vor.u32 %v2915_v56, %v2605_v57  ;;  %v2890_v56 = vld [vmem:[#allocation9 + $0x4] sm:$0xf0]  ;;  %v2563_v57 = vld [vmem:[#allocation9 + $0x80] sm:$0xf] }
 0x11c   :  { %1302 = vmatpush.bf16.msrb.mxu1 %v2452_v49  ;;  %v2603_v49 = vld [vmem:[#allocation9 + $0xd0] sm:$0xf] }
 0x11e   :  { %1290 = vmatpush.bf16.msrb.mxu0 %v2372_v61  ;;  %v2597_v61 = vld [vmem:[#allocation9 + $0xc8] sm:$0xf0] }
 0x11f   :  { %v2600_v10 = vor.u32 %v2913_v9, %v2597_v61 }
 0x120   :  { %1303 = vmatpush.bf16.msrb.mxu1 %v2444_v62  ;;  %v2595_v62 = vld [vmem:[#allocation9 + $0xc0] sm:$0xf] }
 0x121   :  { %v2596_v52 = vor.u32 %v2914_v2, %v2595_v62  ;;  %v2501_v62 = vld [vmem:[#allocation9 + $0x8] sm:$0xf0] }
 0x122   :  { %1499 = vmatpush.bf16.msra.mxu0 %v2556_v28 }
 0x124   :  { %1304 = vmatpush.bf16.msrb.mxu1 %v2436_v18  ;;  %v2587_v18 = vld [vmem:[#allocation9 + $0xb0] sm:$0xf] }
 0x17d   :  { %v957_v29 = vpop.xlane.xlu0 %956 }
 0x17e   :  { %v968_v33 = vmul.f32 %v3376_v16, %v957_v29  ;;  %v2620_v29 = vor.u32 %v2920_v27, %v2619_v26  ;;  %v2911_v26 = vld [vmem:[#allocation9 + $0xb4] sm:$0xf]  ;;  %v2589_v27 = vld [vmem:[#allocation9 + $0xb8] sm:$0xf0] }
 0x17f   :  { %v2592_v28 = vor.u32 %v2911_v26, %v2589_v27 }
 0x180   :  { %v3381_v20 = vsub.f32 %v949_v53, %v968_v33  ;;  %v3385_v36 = vsub.f32 %v950_v7, %v968_v33  ;;  %v2557_v33 = vld [vmem:[#allocation9 + $0x78] sm:$0xf0]  ;;  %1513 = vmatpush.bf16.msra.mxu1 %v2620_v29  ;;  %v2515_v29 = vld [vmem:[#allocation9 + $0x20] sm:$0xf] }
 0x181   :  { %v2560_v35 = vor.u32 %v2903_v30, %v2557_v33  ;;  %v2894_v30 = vld [vmem:[#allocation9 + $0x24] sm:$0xf0]  ;;  %v2579_v33 = vld [vmem:[#allocation9 + $0xa0] sm:$0xf] }
 0x182   :  { %v974_v37 = vmul.f32 %v3381_v20, %v3381_v20  ;;  %v975_v38 = vmul.f32 %v3385_v36, %v3385_v36 }
 0x184   :  { %v978_v39 = vadd.f32 %v975_v38, %v974_v37  ;;  %v2547_v37 = vld [vmem:[#allocation9 + $0x60] sm:$0xf]  ;;  %v2902_v38 = vld [vmem:[#allocation9 + $0x64] sm:$0xf0] }
 0x185   :  { %v960_v40 = vpop.xlane.xlu0 %959 }
 0x186   :  { %v969_v1 = vmul.f32 %v3376_v16, %v960_v40  ;;  %979 = vadd.xlane.f32.xlu1 %v978_v39  ;;  %v2624_v39 = vor.u32 %v2919_v34, %v2621_v32  ;;  %v2548_v40 = vor.u32 %v2902_v38, %v2547_v37  ;;  %v2516_v34 = vor.u32 %v2894_v30, %v2515_v29  ;;  %v2893_v32 = vld [vmem:[#allocation9 + $0x24] sm:$0xf]  ;;  %v2517_v37 = vld [vmem:[#allocation9 + $0x28] sm:$0xf0] }
 0x188   :  { %v3394_v5 = vsub.f32 %v951_v13, %v969_v1  ;;  %v3398_v53 = vsub.f32 %v952_v14, %v969_v1  ;;  %v2389_v13 = vld [vmem:[#allocation9 + $0x128] sm:$0xf0]  ;;  %v2611_v1 = vld [vmem:[#allocation9 + $0xe0] sm:$0xf]  ;;  %1500 = vmatpush.bf16.msra.mxu0 %v2548_v40  ;;  %v2909_v40 = vld [vmem:[#allocation9 + $0xa4] sm:$0xf] }
 0x189   :  { %v2392_v50 = vor.u32 %v2925_v11, %v2389_v13  ;;  %v2453_v14 = vld [vmem:[#allocation9 + $0x1a8] sm:$0xf0]  ;;  %v2539_v11 = vld [vmem:[#allocation9 + $0x50] sm:$0xf]  ;;  %v2900_v13 = vld [vmem:[#allocation9 + $0x54] sm:$0xf0] }
 0x18a   :  { %v976_v7 = vmul.f32 %v3394_v5, %v3394_v5  ;;  %v977_v41 = vmul.f32 %v3398_v53, %v3398_v53  ;;  %v2456_v51 = vor.u32 %v2941_v12, %v2453_v14  ;;  %v2916_v12 = vld [vmem:[#allocation9 + $0xd4] sm:$0xf0]  ;;  %v2899_v14 = vld [vmem:[#allocation9 + $0x54] sm:$0xf] }
 0x18b   :  { %1316 = vmatpush.bf16.msrb.mxu2 %v2392_v50  ;;  %v2540_v50 = vor.u32 %v2900_v13, %v2539_v11  ;;  %v2604_v54 = vor.u32 %v2916_v12, %v2603_v49  ;;  %v2891_v11 = vld [vmem:[#allocation9 + $0x14] sm:$0xf]  ;;  %v2509_v13 = vld [vmem:[#allocation9 + $0x18] sm:$0xf0] }
 0x18c   :  { %v981_v42 = vadd.f32 %v977_v41, %v976_v7  ;;  %1330 = vmatpush.bf16.msrb.mxu3 %v2456_v51  ;;  %v2918_v7 = vld [vmem:[#allocation9 + $0xe4] sm:$0xf0]  ;;  %v2901_v41 = vld [vmem:[#allocation9 + $0x64] sm:$0xf]  ;;  %v2541_v51 = vld [vmem:[#allocation9 + $0x58] sm:$0xf0] }
 0x18d   :  { %v2552_v44 = vor.u32 %v2901_v41, %v2549_v43  ;;  %v2544_v55 = vor.u32 %v2899_v14, %v2541_v51  ;;  %1501 = vmatpush.bf16.msra.mxu0 %v2540_v50  ;;  %v2892_v43 = vld [vmem:[#allocation9 + $0x14] sm:$0xf0]  ;;  %v2512_v50 = vor.u32 %v2891_v11, %v2509_v13  ;;  %v2907_v12 = vld [vmem:[#allocation9 + $0x94] sm:$0xf]  ;;  %v2573_v14 = vld [vmem:[#allocation9 + $0x98] sm:$0xf0] }
 0x18e   :  { %982 = vadd.xlane.f32.xlu1 %v981_v42  ;;  %v2612_v42 = vor.u32 %v2918_v7, %v2611_v1  ;;  %v2581_v1 = vld [vmem:[#allocation9 + $0xa8] sm:$0xf0] }
 0x18f   :  { %1317 = vmatpush.bf16.msrb.mxu2 %v2384_v0  ;;  %v2532_v0 = vor.u32 %v2898_v60, %v2531_v59  ;;  %v2584_v7 = vor.u32 %v2909_v40, %v2581_v1  ;;  %v2906_v59 = vld [vmem:[#allocation9 + $0x84] sm:$0xf0]  ;;  %v2889_v60 = vld [vmem:[#allocation9 + $0x4] sm:$0xf] }
 0x190   :  { %1331 = vmatpush.bf16.msrb.mxu3 %v2448_v6  ;;  %1514 = vmatpush.bf16.msra.mxu1 %v2612_v42  ;;  %v2533_v6 = vld [vmem:[#allocation9 + $0x48] sm:$0xf0]  ;;  %v2507_v42 = vld [vmem:[#allocation9 + $0x10] sm:$0xf]  ;;  %v2504_v2 = vor.u32 %v2889_v60, %v2501_v62  ;;  %v2982_v60 = vld [vmem:[#allocation9 + $0x2e4] sm:$0xf0] }
 0x191   :  { %v2536_v8 = vor.u32 %v2897_v3, %v2533_v6  ;;  %1502 = vmatpush.bf16.msra.mxu0 %v2532_v0  ;;  %v2564_v0 = vor.u32 %v2906_v59, %v2563_v57  ;;  %v2905_v3 = vld [vmem:[#allocation9 + $0x84] sm:$0xf]  ;;  %v2565_v6 = vld [vmem:[#allocation9 + $0x88] sm:$0xf0]  ;;  %v2759_v59 = vld [vmem:[#allocation9 + $0x2e0] sm:$0xf] }
 0x192   :  { %v2965_v62 = vld [vmem:[#allocation9 + $0x264] sm:$0xf] }
 0x193   :  { %1318 = vmatpush.bf16.msrb.mxu2 %v2376_v21  ;;  %v2524_v21 = vor.u32 %v2896_v17, %v2523_v4 }
 0x194   :  { %1332 = vmatpush.bf16.msrb.mxu3 %v2440_v24  ;;  %1515 = vmatpush.bf16.msra.mxu1 %v2604_v54  ;;  %v2588_v24 = vor.u32 %v2912_v63, %v2587_v18  ;;  %v2576_v54 = vor.u32 %v2907_v12, %v2573_v14 }
 0x195   :  { %1503 = vmatpush.bf16.msra.mxu0 %v2524_v21 }
 0x197   :  { %1527 = vmatpush.bf16.msra.mxu2 %v2560_v35  ;;  %v2910_v35 = vld [vmem:[#allocation9 + $0xa4] sm:$0xf0] }
 0x198   :  { %1541 = vmatpush.bf16.msra.mxu3 %v2624_v39  ;;  %1516 = vmatpush.bf16.msra.mxu1 %v2596_v52  ;;  %v2580_v38 = vor.u32 %v2910_v35, %v2579_v33  ;;  %v2520_v39 = vor.u32 %v2893_v32, %v2517_v37  ;;  %v954_v32 = vld [vmem:[#allocation8] sm:$0x3] }
 0x199   :  { %1504 = vmatpush.bf16.msra.mxu0 %v2516_v34  ;;  %v1022_v1 = vperm.slane %v954_v32, 0 }
 0x19b   :  { %1528 = vmatpush.bf16.msra.mxu2 %v2552_v44  ;;  %v2508_v44 = vor.u32 %v2892_v43, %v2507_v42 }
 0x19c   :  { %1542 = vmatpush.bf16.msra.mxu3 %v2616_v48  ;;  %1517 = vmatpush.bf16.msra.mxu1 %v2588_v24  ;;  %v2908_v48 = vld [vmem:[#allocation9 + $0x94] sm:$0xf0] }
 0x19d   :  { %v2572_v49 = vor.u32 %v2908_v48, %v2571_v45  ;;  %1505 = vmatpush.bf16.msra.mxu0 %v2508_v44  ;;  %v2703_v45 = vld [vmem:[#allocation9 + $0x270] sm:$0xf]  ;;  %v2984_v44 = vld [vmem:[#allocation9 + $0x2f4] sm:$0xf0] }
 0x19f   :  { %1529 = vmatpush.bf16.msra.mxu2 %v2544_v55  ;;  %v2499_v55 = vld [vmem:[#allocation9] sm:$0xf] }
 0x1a0   :  { %1543 = vmatpush.bf16.msra.mxu3 %v2608_v58  ;;  %1518 = vmatpush.bf16.msra.mxu1 %v2580_v38  ;;  %v2500_v58 = vor.u32 %v2890_v56, %v2499_v55  ;;  %v2966_v55 = vld [vmem:[#allocation9 + $0x264] sm:$0xf0] }
 0x1a2   :  { %1506 = vmatpush.bf16.msra.mxu0 %v2500_v58 }
 0x1a3   :  { %1530 = vmatpush.bf16.msra.mxu2 %v2536_v8  ;;  %v2568_v8 = vor.u32 %v2905_v3, %v2565_v6  ;;  %v2761_v3 = vld [vmem:[#allocation9 + $0x2e8] sm:$0xf0] }
 0x1a4   :  { %1544 = vmatpush.bf16.msra.mxu3 %v2600_v10  ;;  %1519 = vmatpush.bf16.msra.mxu1 %v2572_v49  ;;  %v2705_v49 = vld [vmem:[#allocation9 + $0x278] sm:$0xf0] }
 0x1a7   :  { %1531 = vmatpush.bf16.msra.mxu2 %v2528_v25  ;;  %v953_v25 = vld [vmem:[%s3488_s3] sm:$0x3] }
 0x1a8   :  { %1545 = vmatpush.bf16.msra.mxu3 %v2592_v28  ;;  %1520 = vmatpush.bf16.msra.mxu1 %v2564_v0  ;;  %v1013_v29 = vperm.slane %v953_v25, 0  ;;  %v1014_v33 = vperm.slane %v953_v25, 1  ;;  %v2697_v0 = vld [vmem:[#allocation9 + $0x268] sm:$0xf0] }
 0x1ab   :  { %1532 = vmatpush.bf16.msra.mxu2 %v2520_v39 }
 0x1ac   :  { %1546 = vmatpush.bf16.msra.mxu3 %v2584_v7 }
 0x1af   :  { %1533 = vmatpush.bf16.msra.mxu2 %v2512_v50  ;;  %v2769_v50 = vld [vmem:[#allocation9 + $0x2f8] sm:$0xf0] }
 0x1b0   :  { %1547 = vmatpush.bf16.msra.mxu3 %v2576_v54  ;;  %v2695_v54 = vld [vmem:[#allocation9 + $0x260] sm:$0xf] }
 0x1b1   :  { %v2696_v6 = vor.u32 %v2966_v55, %v2695_v54 }
 0x1b3   :  { %1534 = vmatpush.bf16.msra.mxu2 %v2504_v2  ;;  %v2981_v2 = vld [vmem:[#allocation9 + $0x2e4] sm:$0xf] }
 0x1b4   :  { %1548 = vmatpush.bf16.msra.mxu3 %v2568_v8  ;;  %v2687_v8 = vld [vmem:[#allocation9 + $0x250] sm:$0xf] }
 0x1f9   :  { %v980_v41 = vpop.xlane.xlu1 %979 }
 0x1fa   :  { %v984_v46 = vmul.f32 %v980_v41, %v3376_v16  ;;  %v1023_v41 = vperm.slane %v954_v32, 1 }
 0x1fc   :  { %v986_v51 = vadd.f32 1e-05, %v984_v46  ;;  %v2767_v46 = vld [vmem:[#allocation9 + $0x2f0] sm:$0xf] }
 0x1fe   :  { %3002 = vrsqrt.f32 %v986_v51  ;;  %vm994_vm10 = vweird.f32 %v986_v51 }
 0x201   :  { %v983_v52 = vpop.xlane.xlu1 %982 }
 0x202   :  { %v985_v9 = vmul.f32 %v983_v52, %v3376_v16  ;;  %v2760_v52 = vor.u32 %v2982_v60, %v2759_v59 }
 0x204   :  { %v3003_v61 = vpop.eup %3002  ;;  %v987_v10 = vadd.f32 1e-05, %v985_v9  ;;  %v2964_v9 = vld [vmem:[#allocation9 + $0x254] sm:$0xf0] }
 0x205   :  { %v989_v4 = vmul.f32 %v3003_v61, %v986_v51  ;;  %vm995_vm9 = vweird.f32 %v3003_v61  ;;  %v2768_v51 = vor.u32 %v2984_v44, %v2767_v46  ;;  %v2735_v44 = vld [vmem:[#allocation9 + $0x2b0] sm:$0xf] }
 0x206   :  { %3004 = vrsqrt.f32 %v987_v10  ;;  %vm996_vm11 = vmor %vm994_vm10, %vm995_vm9  ;;  %vm1004_vm13 = vweird.f32 %v987_v10 }
 0x207   :  { %v990_v17 = vmul.f32 %v3003_v61, %v989_v4  ;;  %v2751_v4 = vld [vmem:[#allocation9 + $0x2d0] sm:$0xf] }
 0x209   :  { %v991_v18 = vmul.f32 0.5, %v990_v17  ;;  %v2980_v17 = vld [vmem:[#allocation9 + $0x2d4] sm:$0xf0] }
 0x20a   :  { %v2752_v25 = vor.u32 %v2980_v17, %v2751_v4  ;;  %v2956_v4 = vld [vmem:[#allocation9 + $0x214] sm:$0xf0] }
 0x20b   :  { %v992_v21 = vsub.f32 1.5, %v991_v18  ;;  %v2963_v18 = vld [vmem:[#allocation9 + $0x254] sm:$0xf] }
 0x20c   :  { %v3005_v63 = vpop.eup %3004 }
 0x20d   :  { %v993_v15 = vmul.f32 %v3003_v61, %v992_v21  ;;  %v999_v23 = vmul.f32 %v3005_v63, %v987_v10  ;;  %vm1005_vm12 = vweird.f32 %v3005_v63  ;;  %v2764_v10 = vor.u32 %v2981_v2, %v2761_v3  ;;  %v2689_v21 = vld [vmem:[#allocation9 + $0x258] sm:$0xf0]  ;;  %v2974_v2 = vld [vmem:[#allocation9 + $0x2a4] sm:$0xf0]  ;;  %v2957_v3 = vld [vmem:[#allocation9 + $0x224] sm:$0xf] }
 0x20e   :  { %vm1006_vm14 = vmor %vm1004_vm13, %vm1005_vm12 }
 0x20f   :  { %v1000_v24 = vmul.f32 %v3005_v63, %v999_v23  ;;  %v997_v26 = vsel %vm996_vm11, %v3003_v61, %v993_v15  ;;  %v2700_v61 = vor.u32 %v2965_v62, %v2697_v0  ;;  %v2753_v15 = vld [vmem:[#allocation9 + $0x2d8] sm:$0xf0]  ;;  %v2679_v23 = vld [vmem:[#allocation9 + $0x240] sm:$0xf] }
 0x210   :  { %v1008_v30 = vmul.f32 %v997_v26, %v3381_v20  ;;  %v1009_v34 = vmul.f32 %v997_v26, %v3385_v36  ;;  %v2968_v20 = vld [vmem:[#allocation9 + $0x274] sm:$0xf0]  ;;  %v2967_v36 = vld [vmem:[#allocation9 + $0x274] sm:$0xf]  ;;  %v2962_v26 = vld [vmem:[#allocation9 + $0x244] sm:$0xf0] }
 0x211   :  { %v1001_v27 = vmul.f32 0.5, %v1000_v24  ;;  %v2704_v14 = vor.u32 %v2968_v20, %v2703_v45  ;;  %v2708_v57 = vor.u32 %v2967_v36, %v2705_v49  ;;  %v2688_v24 = vor.u32 %v2964_v9, %v2687_v8  ;;  %v2976_v36 = vld [vmem:[#allocation9 + $0x2b4] sm:$0xf0]  ;;  %v2959_v49 = vld [vmem:[#allocation9 + $0x234] sm:$0xf] }
 0x212   :  { %v1017_v38 = vmul.f32 %v1013_v29, %v1008_v30  ;;  %v1018_v7 = vmul.f32 %v1014_v33, %v1009_v34  ;;  %v2692_v30 = vor.u32 %v2963_v18, %v2689_v21  ;;  %v2961_v34 = vld [vmem:[#allocation9 + $0x244] sm:$0xf]  ;;  %v2727_v0 = vld [vmem:[#allocation9 + $0x2a0] sm:$0xf]  ;;  %v2729_v8 = vld [vmem:[#allocation9 + $0x2a8] sm:$0xf0] }
 0x213   :  { %v1002_v28 = vsub.f32 1.5, %v1001_v27  ;;  %v2743_v27 = vld [vmem:[#allocation9 + $0x2c0] sm:$0xf]  ;;  %v2719_v21 = vld [vmem:[#allocation9 + $0x290] sm:$0xf] }
 0x214   :  { %v3413_v48 = vadd.f32 %v1022_v1, %v1017_v38  ;;  %v2745_v38 = vld [vmem:[#allocation9 + $0x2c8] sm:$0xf0] }
 0x215   :  { %v1003_v35 = vmul.f32 %v3005_v63, %v1002_v28  ;;  %v2978_v28 = vld [vmem:[#allocation9 + $0x2c4] sm:$0xf0] }
 0x217   :  { %v1007_v37 = vsel %vm1006_vm14, %v3005_v63, %v1003_v35  ;;  %v2979_v63 = vld [vmem:[#allocation9 + $0x2d4] sm:$0xf]  ;;  %v2681_v35 = vld [vmem:[#allocation9 + $0x248] sm:$0xf0] }
 0x218   :  { %v1010_v39 = vmul.f32 %v1007_v37, %v3394_v5  ;;  %v1011_v40 = vmul.f32 %v1007_v37, %v3398_v53  ;;  %v2983_v5 = vld [vmem:[#allocation9 + $0x2f4] sm:$0xf]  ;;  %v3419_v53 = vadd.f32 %v1023_v41, %v1018_v7  ;;  %v2977_v37 = vld [vmem:[#allocation9 + $0x2c4] sm:$0xf]  ;;  %v2744_v7 = vor.u32 %v2978_v28, %v2743_v27  ;;  %v2647_v27 = vld [vmem:[#allocation9 + $0x200] sm:$0xf] }
 0x219   :  { %v2772_v58 = vor.u32 %v2983_v5, %v2769_v50  ;;  %v2748_v45 = vor.u32 %v2977_v37, %v2745_v38  ;;  %v2954_v28 = vld [vmem:[#allocation9 + $0x204] sm:$0xf0] }
 0x21a   :  { %v1019_v42 = vmul.f32 %v1013_v29, %v1010_v39  ;;  %v1020_v43 = vmul.f32 %v1014_v33, %v1011_v40  ;;  %v2756_v33 = vor.u32 %v2979_v63, %v2753_v15  ;;  %v1030_v39 = vrot.slane %v3413_v48, 7  ;;  %v2972_v63 = vld [vmem:[#allocation9 + $0x294] sm:$0xf0]  ;;  %v2955_v15 = vld [vmem:[#allocation9 + $0x214] sm:$0xf] }
 0x21b   :  { %v1031_v40 = vrot.slane %v3419_v53, 7 }
 0x21c   :  { %v3415_v11 = vadd.f32 %v1022_v1, %v1019_v42  ;;  %v3417_v13 = vadd.f32 %v1023_v41, %v1020_v43  ;;  %v2680_v1 = vor.u32 %v2962_v26, %v2679_v23  ;;  %v2684_v41 = vor.u32 %v2961_v34, %v2681_v35  ;;  %v2671_v42 = vld [vmem:[#allocation9 + $0x230] sm:$0xf]  ;;  %v2960_v43 = vld [vmem:[#allocation9 + $0x234] sm:$0xf0]  ;;  %v2657_v23 = vld [vmem:[#allocation9 + $0x218] sm:$0xf0] }
 0x21d   :  { %v2672_v55 = vor.u32 %v2960_v43, %v2671_v42  ;;  %v2720_v26 = vor.u32 %v2972_v63, %v2719_v21  ;;  %v2970_v34 = vld [vmem:[#allocation9 + $0x284] sm:$0xf0]  ;;  %v2953_v35 = vld [vmem:[#allocation9 + $0x204] sm:$0xf] }
 0x21e   :  { %v1088_v12 = vpack.c.bf16 %v3415_v11, %v3413_v48  ;;  %v1089_v56 = vpack.c.bf16 %v3417_v13, %v3419_v53  ;;  %v1032_v29 = vrot.slane %v3415_v11, 7  ;;  %v1033_v32 = vrot.slane %v3417_v13, 7 }
 0x21f   :  { %v1044_v37 = vrot.slane %v3415_v11, 1  ;;  %v1045_v38 = vrot.slane %v3417_v13, 1 }
 0x220   :  { %1291 = vmatmul.bf16.vlgmr.msrb.gmra.mxu0 %v1088_v12  ;;  %1319 = vmatmul.bf16.vlgmr.msrb.gmra.mxu2 %v1088_v12  ;;  %v1034_v20 = vsel %vm153_vm0, %v1030_v39, %v1032_v29  ;;  %v1036_v46 = vsel %vm153_vm0, %v1032_v29, %v1030_v39  ;;  %v1035_v5 = vsel %vm153_vm0, %v1031_v40, %v1033_v32  ;;  %v2673_v12 = vld [vmem:[#allocation9 + $0x238] sm:$0xf0]  ;;  %v2711_v29 = vld [vmem:[#allocation9 + $0x280] sm:$0xf]  ;;  %v2969_v39 = vld [vmem:[#allocation9 + $0x284] sm:$0xf] }
 0x221   :  { %1305 = vmatmul.bf16.vlgmr.msrb.gmra.mxu1 %v1089_v56  ;;  %1333 = vmatmul.bf16.vlgmr.msrb.gmra.mxu3 %v1089_v56  ;;  %v1037_v50 = vsel %vm153_vm0, %v1033_v32, %v1031_v40  ;;  %v2628_v54 = vpack.c.bf16 %v1034_v20, %v1036_v46  ;;  %v2736_v56 = vor.u32 %v2976_v36, %v2735_v44  ;;  %v2649_v32 = vld [vmem:[#allocation9 + $0x208] sm:$0xf0] }
 0x222   :  { %1750 = vmatpush.bf16.msrb.mxu0 %v2704_v14  ;;  %1764 = vmatpush.bf16.msrb.mxu1 %v2768_v51  ;;  %v2975_v14 = vld [vmem:[#allocation9 + $0x2b4] sm:$0xf]  ;;  %v2737_v51 = vld [vmem:[#allocation9 + $0x2b8] sm:$0xf0]  ;;  %v2633_v59 = vpack.c.bf16 %v1035_v5, %v1037_v50  ;;  %v2676_v60 = vor.u32 %v2959_v49, %v2673_v12  ;;  %v2713_v40 = vld [vmem:[#allocation9 + $0x288] sm:$0xf0]  ;;  %v2712_v42 = vor.u32 %v2970_v34, %v2711_v29 }
 0x223   :  { %1778 = vmatpush.bf16.msrb.mxu2 %v2708_v57  ;;  %1792 = vmatpush.bf16.msrb.mxu3 %v2772_v58  ;;  %v2663_v57 = vld [vmem:[#allocation9 + $0x220] sm:$0xf]  ;;  %v2958_v58 = vld [vmem:[#allocation9 + $0x224] sm:$0xf0]  ;;  %v2740_v62 = vor.u32 %v2975_v14, %v2737_v51  ;;  %v2652_v43 = vor.u32 %v2953_v35, %v2649_v32 }
 0x224   :  { %v2664_v9 = vor.u32 %v2958_v58, %v2663_v57 }
 0x226   :  { %1751 = vmatpush.bf16.msrb.mxu0 %v2696_v6  ;;  %1765 = vmatpush.bf16.msrb.mxu1 %v2760_v52  ;;  %v2665_v6 = vld [vmem:[#allocation9 + $0x228] sm:$0xf0]  ;;  %v2973_v52 = vld [vmem:[#allocation9 + $0x2a4] sm:$0xf] }
 0x227   :  { %1779 = vmatpush.bf16.msrb.mxu2 %v2700_v61  ;;  %1793 = vmatpush.bf16.msrb.mxu3 %v2764_v10  ;;  %v2728_v61 = vor.u32 %v2974_v2, %v2727_v0  ;;  %v2655_v10 = vld [vmem:[#allocation9 + $0x210] sm:$0xf]  ;;  %v2668_v17 = vor.u32 %v2957_v3, %v2665_v6  ;;  %v2732_v18 = vor.u32 %v2973_v52, %v2729_v8  ;;  %v1810_v52 = vld [vmem:[%s3491_s6] sm:$0x3] }
 0x228   :  { %v2656_v47 = vor.u32 %v2956_v4, %v2655_v10  ;;  %v1812_v4 = vperm.slane %v1810_v52, 0 }
 0x22a   :  { %1752 = vmatpush.bf16.msrb.mxu0 %v2688_v24  ;;  %1766 = vmatpush.bf16.msrb.mxu1 %v2752_v25  ;;  %v2971_v24 = vld [vmem:[#allocation9 + $0x294] sm:$0xf]  ;;  %v2721_v25 = vld [vmem:[#allocation9 + $0x298] sm:$0xf0] }
 0x22b   :  { %1780 = vmatpush.bf16.msrb.mxu2 %v2692_v30  ;;  %1794 = vmatpush.bf16.msrb.mxu3 %v2756_v33  ;;  %v2660_v30 = vor.u32 %v2955_v15, %v2657_v23  ;;  %v2724_v33 = vor.u32 %v2971_v24, %v2721_v25  ;;  %v1813_v25 = vperm.slane %v1810_v52, 1 }
 0x22e   :  { %1753 = vmatpush.bf16.msrb.mxu0 %v2680_v1  ;;  %1767 = vmatpush.bf16.msrb.mxu1 %v2744_v7  ;;  %v1042_v1 = vrot.slane %v3413_v48, 1  ;;  %v1043_v7 = vrot.slane %v3419_v53, 1 }
 0x22f   :  { %1781 = vmatpush.bf16.msrb.mxu2 %v2684_v41  ;;  %1795 = vmatpush.bf16.msrb.mxu3 %v2748_v45  ;;  %v2648_v41 = vor.u32 %v2954_v28, %v2647_v27  ;;  %v2716_v45 = vor.u32 %v2969_v39, %v2713_v40 }
 0x230   :  { %2629 = vmatmul.msk.bf16.vlgmr.msra.gmra.mxu0 %vm3305_vm3, %v2628_v54  ;;  %2639 = vmatmul.msk.bf16.vlgmr.msra.gmra.mxu2 %vm3305_vm3, %v2628_v54  ;;  %v1046_v20 = vsel %vm170_vm4, %v1042_v1, %v1044_v37  ;;  %v1048_v11 = vsel %vm170_vm4, %v1044_v37, %v1042_v1  ;;  %v1047_v13 = vsel %vm170_vm4, %v1043_v7, %v1045_v38 }
 0x231   :  { %2634 = vmatmul.msk.bf16.vlgmr.msra.gmra.mxu1 %vm3305_vm3, %v2633_v59  ;;  %2644 = vmatmul.msk.bf16.vlgmr.msra.gmra.mxu3 %vm3305_vm3, %v2633_v59  ;;  %v1049_v48 = vsel %vm170_vm4, %v1045_v38, %v1043_v7  ;;  %v2776_v53 = vpack.c.bf16 %v1048_v11, %v1046_v20 }
 0x232   :  { %1754 = vmatpush.bf16.msrb.mxu0 %v2672_v55  ;;  %1768 = vmatpush.bf16.msrb.mxu1 %v2736_v56  ;;  %v2781_v46 = vpack.c.bf16 %v1049_v48, %v1047_v13 }
 0x233   :  { %1782 = vmatpush.bf16.msrb.mxu2 %v2676_v60  ;;  %1796 = vmatpush.bf16.msrb.mxu3 %v2740_v62 }
 0x236   :  { %1755 = vmatpush.bf16.msrb.mxu0 %v2664_v9  ;;  %1769 = vmatpush.bf16.msrb.mxu1 %v2728_v61 }
 0x237   :  { %1783 = vmatpush.bf16.msrb.mxu2 %v2668_v17  ;;  %1797 = vmatpush.bf16.msrb.mxu3 %v2732_v18 }
 0x23a   :  { %1756 = vmatpush.bf16.msrb.mxu0 %v2656_v47  ;;  %1770 = vmatpush.bf16.msrb.mxu1 %v2720_v26 }
 0x23b   :  { %1784 = vmatpush.bf16.msrb.mxu2 %v2660_v30  ;;  %1798 = vmatpush.bf16.msrb.mxu3 %v2724_v33 }
 0x23e   :  { %1757 = vmatpush.bf16.msrb.mxu0 %v2648_v41  ;;  %1771 = vmatpush.bf16.msrb.mxu1 %v2712_v42 }
 0x23f   :  { %1785 = vmatpush.bf16.msrb.mxu2 %v2652_v43  ;;  %1799 = vmatpush.bf16.msrb.mxu3 %v2716_v45 }
 0x241   :  { %2777 = vmatmul.msk.bf16.vlgmr.msrb.gmra.mxu0 %vm3334_vm7, %v2776_v53  ;;  %2782 = vmatmul.msk.bf16.vlgmr.msrb.gmra.mxu1 %vm3334_vm7, %v2781_v46 }
 0x242   :  { %2787 = vmatmul.msk.bf16.vlgmr.msrb.gmra.mxu2 %vm3334_vm7, %v2776_v53  ;;  %2792 = vmatmul.msk.bf16.vlgmr.msrb.gmra.mxu3 %vm3334_vm7, %v2781_v46 }
 0x29d   :  { %v1292_v31 = vpop.f32.mrf.mxu0 }
 0x29e   :  { %v1306_v44 = vpop.f32.mrf.mxu1 }
 0x29f   :  { %v1307_v60 = vadd.f32 %v1306_v44, %v1292_v31 }
 0x2a3   :  { %v1320_v36 = vpop.f32.mrf.mxu2 }
 0x2a4   :  { %v1334_v49 = vpop.f32.mrf.mxu3 }
 0x2a5   :  { %v1294_v5 = vpop.f32.mrf.mxu0  ;;  %v1335_v3 = vadd.f32 %v1334_v49, %v1320_v36 }
 0x2a6   :  { %v1308_v50 = vpop.f32.mrf.mxu1 }
 0x2a7   :  { %v1309_v61 = vadd.f32 %v1308_v50, %v1294_v5 }
 0x2ab   :  { %v1322_v12 = vpop.f32.mrf.mxu2 }
 0x2ac   :  { %v1336_v14 = vpop.f32.mrf.mxu3 }
 0x2ad   :  { %v1508_v51 = vpop.f32.mrf.mxu0  ;;  %v1337_v47 = vadd.f32 %v1336_v14, %v1322_v12 }
 0x2ae   :  { %v1522_v54 = vpop.f32.mrf.mxu1  ;;  %v1509_v0 = vadd.f32 %v1508_v51, %v1307_v60 }
 0x2b0   :  { %v1523_v8 = vadd.f32 %v1522_v54, %v1509_v0 }
 0x2b3   :  { %v1536_v55 = vpop.f32.mrf.mxu2 }
 0x2b4   :  { %v1550_v56 = vpop.f32.mrf.mxu3  ;;  %v1537_v9 = vadd.f32 %v1536_v55, %v1335_v3  ;;  %v1824_v3 = vld [vmem:[%s3492_s7] sm:$0x3] }
 0x2b5   :  { %v1510_v57 = vpop.f32.mrf.mxu0 }
 0x2b6   :  { %v1524_v58 = vpop.f32.mrf.mxu1  ;;  %v1551_v21 = vadd.f32 %v1550_v56, %v1537_v9  ;;  %v1511_v63 = vadd.f32 %v1510_v57, %v1309_v61  ;;  %v1825_v9 = vld [vmem:[#allocation11] sm:$0x3]  ;;  %v1877_v61 = vperm.slane %v1824_v3, 0 }
 0x2b8   :  { %v1525_v29 = vadd.f32 %v1524_v58, %v1511_v63  ;;  %v1886_v63 = vperm.slane %v1825_v9, 0 }
 0x2bb   :  { %v1538_v59 = vpop.f32.mrf.mxu2 }
 0x2bc   :  { %v1552_v62 = vpop.f32.mrf.mxu3  ;;  %v1539_v30 = vadd.f32 %v1538_v59, %v1337_v47 }
 0x2be   :  { %v1759_v22 = vpop.f32.mrf.mxu0  ;;  %v1773_v2 = vpop.f32.mrf.mxu1  ;;  %v1553_v39 = vadd.f32 %v1552_v62, %v1539_v30 }
 0x2bf   :  { %v1774_v6 = vadd.f32 %v1773_v2, %v1759_v22 }
 0x2c1   :  { %v1806_v10 = vadd.f32 %v1774_v6, %v1523_v8 }
 0x2c3   :  { %v1816_v28 = vadd.f32 %v1812_v4, %v1806_v10 }
 0x2c5   :  { %v1787_v17 = vpop.f32.mrf.mxu2  ;;  %v1801_v18 = vpop.f32.mrf.mxu3  ;;  %v1820_v35 = vmax.f32 %v1816_v28, 0.0 }
 0x2c6   :  { %v1802_v15 = vadd.f32 %v1801_v18, %v1787_v17  ;;  %v1761_v23 = vpop.f32.mrf.mxu0  ;;  %v1775_v24 = vpop.f32.mrf.mxu1  ;;  %v1894_v17 = vld [vmem:[%s3494_s9] sm:$0x3] }
 0x2c7   :  { %v1776_v27 = vadd.f32 %v1775_v24, %v1761_v23  ;;  %v1896_v47 = vperm.slane %v1894_v17, 0 }
 0x2c8   :  { %v1807_v26 = vadd.f32 %v1802_v15, %v1551_v21  ;;  %v1887_v15 = vperm.slane %v1825_v9, 1 }
 0x2c9   :  { %v1808_v34 = vadd.f32 %v1776_v27, %v1525_v29 }
 0x2ca   :  { %v1817_v33 = vadd.f32 %v1813_v25, %v1807_v26  ;;  %v1897_v26 = vperm.slane %v1894_v17, 1 }
 0x2cb   :  { %v1818_v41 = vadd.f32 %v1812_v4, %v1808_v34 }
 0x2cc   :  { %v1821_v32 = vmax.f32 %v1817_v33, 0.0 }
 0x2cd   :  { %v1789_v37 = vpop.f32.mrf.mxu2  ;;  %v1803_v38 = vpop.f32.mrf.mxu3  ;;  %v1822_v43 = vmax.f32 %v1818_v41, 0.0 }
 0x2ce   :  { %v1804_v40 = vadd.f32 %v1803_v38, %v1789_v37  ;;  %v1826_v1 = vadd.f32 %v1821_v32, %v1820_v35 }
 0x2d0   :  { %v1809_v7 = vadd.f32 %v1804_v40, %v1553_v39  ;;  %1827 = vadd.xlane.f32.xlu2 %v1826_v1 }
 0x2d2   :  { %v1819_v42 = vadd.f32 %v1813_v25, %v1809_v7 }
 0x2d4   :  { %v1823_v45 = vmax.f32 %v1819_v42, 0.0 }
 0x2d6   :  { %v1829_v20 = vadd.f32 %v1823_v45, %v1822_v43 }
 0x2d8   :  { %1830 = vadd.xlane.f32.xlu2 %v1829_v20 }
 0x343   :  { %v1828_v11 = vpop.xlane.xlu2 %1827 }
 0x344   :  { %v1832_v13 = vmul.f32 %v1828_v11, %v3376_v16  ;;  %v1917_v11 = vand.u32 127, %v118_v19 }
 0x346   :  { %v1834_v48 = vsub.f32 %v1820_v35, %v1832_v13  ;;  %v1835_v53 = vsub.f32 %v1821_v32, %v1832_v13 }
 0x348   :  { %v1838_v46 = vmul.f32 %v1834_v48, %v1834_v48  ;;  %v1839_v31 = vmul.f32 %v1835_v53, %v1835_v53 }
 0x34a   :  { %v1842_v44 = vadd.f32 %v1839_v31, %v1838_v46 }
 0x34b   :  { %v1831_v36 = vpop.xlane.xlu2 %1830 }
 0x34c   :  { %v1833_v49 = vmul.f32 %v1831_v36, %v3376_v16  ;;  %1843 = vadd.xlane.f32.xlu0 %v1842_v44 }
 0x34e   :  { %v1836_v5 = vsub.f32 %v1822_v43, %v1833_v49  ;;  %v1837_v50 = vsub.f32 %v1823_v45, %v1833_v49  ;;  %v1911_v45 = vstv %s3495_s10 }
 0x350   :  { %v1840_v12 = vmul.f32 %v1836_v5, %v1836_v5  ;;  %v1841_v14 = vmul.f32 %v1837_v50, %v1837_v50 }
 0x352   :  { %v1845_v51 = vadd.f32 %v1841_v14, %v1840_v12 }
 0x354   :  { %1846 = vadd.xlane.f32.xlu1 %v1845_v51 }
 0x3bf   :  { %v1844_v54 = vpop.xlane.xlu0 %1843 }
 0x3c0   :  { %v1848_v55 = vmul.f32 %v1844_v54, %v3376_v16 }
 0x3c2   :  { %v1850_v56 = vadd.f32 1e-05, %v1848_v55 }
 0x3c4   :  { %3006 = vrsqrt.f32 %v1850_v56  ;;  %vm1858_vm0 = vweird.f32 %v1850_v56 }
 0x3c7   :  { %v1847_v57 = vpop.xlane.xlu1 %1846 }
 0x3c8   :  { %v1849_v58 = vmul.f32 %v1847_v57, %v3376_v16  ;;  %v1878_v16 = vperm.slane %v1824_v3, 1 }
 0x3ca   :  { %v3007_v59 = vpop.eup %3006  ;;  %v1851_v60 = vadd.f32 1e-05, %v1849_v58 }
 0x3cb   :  { %v1853_v62 = vmul.f32 %v3007_v59, %v1850_v56  ;;  %vm1859_vm15 = vweird.f32 %v3007_v59 }
 0x3cc   :  { %3008 = vrsqrt.f32 %v1851_v60  ;;  %vm1860_vm1 = vmor %vm1858_vm0, %vm1859_vm15  ;;  %vm1868_vm3 = vweird.f32 %v1851_v60 }
 0x3cd   :  { %v1854_v0 = vmul.f32 %v3007_v59, %v1853_v62 }
 0x3cf   :  { %v1855_v22 = vmul.f32 0.5, %v1854_v0 }
 0x3d1   :  { %v1856_v2 = vsub.f32 1.5, %v1855_v22 }
 0x3d2   :  { %v3009_v6 = vpop.eup %3008 }
 0x3d3   :  { %v1857_v52 = vmul.f32 %v3007_v59, %v1856_v2  ;;  %v1863_v8 = vmul.f32 %v3009_v6, %v1851_v60  ;;  %vm1869_vm2 = vweird.f32 %v3009_v6 }
 0x3d4   :  { %vm1870_vm4 = vmor %vm1868_vm3, %vm1869_vm2 }
 0x3d5   :  { %v1861_v10 = vsel %vm1860_vm1, %v3007_v59, %v1857_v52  ;;  %v1864_v4 = vmul.f32 %v3009_v6, %v1863_v8 }
 0x3d6   :  { %v1872_v18 = vmul.f32 %v1861_v10, %v1834_v48  ;;  %v1873_v21 = vmul.f32 %v1861_v10, %v1835_v53  ;;  %v1919_v48 = vadd.s32 4294967288, %v1917_v11 }
 0x3d7   :  { %v1865_v23 = vmul.f32 0.5, %v1864_v4 }
 0x3d8   :  { %v1881_v24 = vmul.f32 %v1877_v61, %v1872_v18  ;;  %v1882_v25 = vmul.f32 %v1878_v16, %v1873_v21 }
 0x3d9   :  { %v1866_v27 = vsub.f32 1.5, %v1865_v23 }
 0x3da   :  { %v1890_v28 = vadd.f32 %v1886_v63, %v1881_v24  ;;  %v1891_v29 = vadd.f32 %v1887_v15, %v1882_v25 }
 0x3db   :  { %v1867_v30 = vmul.f32 %v3009_v6, %v1866_v27 }
 0x3dc   :  { %v1900_v33 = vmul.f32 %v1896_v47, %v1890_v28  ;;  %v1901_v34 = vmul.f32 %v1897_v26, %v1891_v29 }
 0x3dd   :  { %v1871_v35 = vsel %vm1870_vm4, %v3009_v6, %v1867_v30 }
 0x3de   :  { %v1904_v32 = vadd.f32 %v1901_v34, %v1900_v33  ;;  %v1874_v37 = vmul.f32 %v1871_v35, %v1836_v5  ;;  %v1875_v38 = vmul.f32 %v1871_v35, %v1837_v50 }
 0x3e0   :  { %1905 = vadd.xlane.f32.xlu2 %v1904_v32  ;;  %v1883_v39 = vmul.f32 %v1877_v61, %v1874_v37  ;;  %v1884_v40 = vmul.f32 %v1878_v16, %v1875_v38 }
 0x3e2   :  { %v1892_v1 = vadd.f32 %v1886_v63, %v1883_v39  ;;  %v1893_v7 = vadd.f32 %v1887_v15, %v1884_v40 }
 0x3e4   :  { %v1902_v41 = vmul.f32 %v1896_v47, %v1892_v1  ;;  %v1903_v42 = vmul.f32 %v1897_v26, %v1893_v7 }
 0x3e6   :  { %v1907_v43 = vadd.f32 %v1903_v42, %v1902_v41 }
 0x3e8   :  { %1908 = vadd.xlane.f32.xlu0 %v1907_v43 }
 0x453   :  { %v1906_v20 = vpop.xlane.xlu2 %1905 }
 0x454   :  { %v1912_v13 = vadd.f32 %v1911_v45, %v1906_v20 }
 0x456   :  { %v1918_v31 = vperm.slane %v1912_v13, %v1917_v11 }
 0x45b   :  { %v1909_v53 = vpop.xlane.xlu0 %1908 }
 0x45c   :  { %v1913_v46 = vadd.f32 %v1911_v45, %v1909_v53 }
 0x45e   :  { %v1920_v44 = vperm.slane %v1913_v46, %v1919_v48 }
 0x460   :  { %v1922_v36 = vsel %vm1921_vm5, %v1920_v44, %v1918_v31 }
 0x461   :  { %1925 = vst.msk [vmem:[#allocation12] sm:$0x1] %vm1924_vm6, %v1922_v36 }
 0x462   :  { %1936 = dma.vmem_to_hbm [thread:$0]  %s1932_s30, 16, %s1934_s13, [#allocation5]  }
 0x463   :  { %3160 = dma.done.wait [#allocation5], 16  }
 0x464   :  { %3161 = vsyncadd [#allocation5], 4294967280 }
 0x465   :  { %1941 = vsyncpa [#allocation4], 1 }
 0x466   :  { %1942 = vsyncpa [#allocation7], 1 }
 0x467   :  { %1943 = vsyncpa [#allocation10], 1 }
 0x468   :  { %1944 = vsyncpa [#allocation5], 1 }

</bundles_post_ra>
